<compile_context>
chip_gen: v6e
topology: v6e:2x2x1
jax: 0.10.0
libtpu: 0.0.40
codegen_flags: <defaults>
</compile_context>

<pallas_src>
import numpy as np
import jax
import jax.numpy as jnp
from jax import lax
from jax.experimental import pallas as pl
from jax.experimental.pallas import tpu as pltpu

# ----------------------------------------------------------------- utilities

_BUFFERED_CLS = getattr(pl, "Buffered", None)       # single-buffering of invariant operands
_SINGLE_BUFFER_OK = [_BUFFERED_CLS is not None]
_VMEM_LIMIT_CACHE = [None]


def _vmem_limit():
    """Generation-aware VMEM budget: ~48MB on v7x (64MiB phys), ~96MB on v5e/v6e (128MiB)."""
    if _VMEM_LIMIT_CACHE[0] is None:
        try:
            cap = pltpu.get_tpu_info().vmem_capacity_bytes
            _VMEM_LIMIT_CACHE[0] = int(min(cap * 3 // 4, 100 * 1024 * 1024))
        except Exception:
            _VMEM_LIMIT_CACHE[0] = 48 * 1024 * 1024
    return _VMEM_LIMIT_CACHE[0]


def _compiler_params():
    cls = getattr(pltpu, "CompilerParams", None) or getattr(pltpu, "TPUCompilerParams")
    return cls(dimension_semantics=("parallel",), vmem_limit_bytes=_vmem_limit())


def _const_spec_factory(single_buffer):
    """BlockSpec factory for grid-invariant operands (constant index_map)."""
    use = bool(single_buffer) and _BUFFERED_CLS is not None

    def make(shape, index_map):
        if use:
            return pl.BlockSpec(shape, index_map, pipeline_mode=_BUFFERED_CLS(1))
        return pl.BlockSpec(shape, index_map)

    return make


def _call_with_fallback(build, *args):
    """Run with single-buffered invariant operands; fall back to default double-buffering."""
    if _SINGLE_BUFFER_OK[0]:
        try:
            # block inside the try so lowering/runtime issues surface here (test script only).
            return jax.block_until_ready(build(True)(*args))
        except Exception:
            _SINGLE_BUFFER_OK[0] = False
    return build(False)(*args)


def _pick_row_block(total_rows, w, cin, ss_cout, in_bytes, out_bytes,
                    budget=8 * 1024 * 1024):
    """Largest divisor of total_rows whose per-step (input+output) block fits the budget."""
    best = 1
    for r in range(1, total_rows + 1):
        if total_rows % r:
            continue
        if r * w * (cin * in_bytes + ss_cout * out_bytes) <= budget:
            best = r
    return best


# ---------------------------------------------------------------------------
# Kernel 1: fused 1x1 projection + ConvTranspose2d(kernel=stride=s, pad=0).
# One grid step = R input rows.  One wide MXU matmul:
#   y[(i,j), (di,dj,d)] = sum_cin x[i,j,cin] * Wf[cin, (di,dj,d)]   (+ bias, f32)
# then s lane-slice stores so the output regroup to (N, s*h, s*w, Cout) is a
# free reshape in the wrapper.  s=1 degenerates to the plain 1x1 projection.
# ---------------------------------------------------------------------------
def _make_expand_kernel(R, w, s, sC):
    def kernel(x_ref, wf_ref, bf_ref, o_ref):
        cin = x_ref.shape[-1]
        # (R, w, cin) -> (R*w, cin); contiguous merge of leading dims
        # (layout-trivial when w % 8 == 0; at odd production w a relayout).
        x2 = x_ref[...].reshape(R * w, cin)
        y = jnp.dot(x2, wf_ref[...], preferred_element_type=jnp.float32)
        y = y + bf_ref[0]                                  # bias add kept in f32 (v5e VPU)
        for di in range(s):                                # static unroll
            chunk = y[:, di * sC:(di + 1) * sC].reshape(R, w, sC)
            o_ref[:, di, :, :] = chunk.astype(o_ref.dtype)
    return kernel


def _proj_expand(x_nhwc, op, compute_dtype, out_dtype):
    N, h, w, cin = x_nhwc.shape
    s, cout = op['s'], op['cout']
    sC, ssC = s * cout, s * s * cout
    total_rows = N * h
    R = _pick_row_block(total_rows, w, cin, ssC,
                        np.dtype(compute_dtype).itemsize, np.dtype(out_dtype).itemsize)

    xr = x_nhwc.astype(compute_dtype).reshape(total_rows, w, cin)
    wf, bf = op['wf'], op['bf']                            # (cin, ssC) cdt, (1, ssC) f32

    def build(single_buffer):
        const = _const_spec_factory(single_buffer)
        return pl.pallas_call(
            _make_expand_kernel(R, w, s, sC),
            out_shape=jax.ShapeDtypeStruct((total_rows, s, w, sC), out_dtype),
            grid_spec=pltpu.PrefetchScalarGridSpec(
                num_scalar_prefetch=0,
                grid=(total_rows // R,),
                in_specs=[
                    pl.BlockSpec((R, w, cin), lambda r: (r, 0, 0)),
                    const((cin, ssC), lambda r: (0, 0)),
                    const((1, ssC), lambda r: (0, 0)),
                ],
                out_specs=pl.BlockSpec((R, s, w, sC), lambda r: (r, 0, 0, 0))),
            compiler_params=_compiler_params())

    out = _call_with_fallback(build, xr, wf, bf)
    # (N*h, s, w, s*Cout) -> (N, s*h, s*w, Cout): pure contiguous regrouping (free).
    return out.reshape(N, h * s, w * s, cout)


# ---------------------------------------------------------------------------
# Kernel 2: fused 1x1 projection + Conv2d(3x3, stride=2, pad=1).
# Wrapper builds a stride-2 phase decomposition of the zero-padded input
# (6 planes = 2 row-phases x 3 tap-column sets), so each of the 9 taps is a
# contiguous static row-slice in the kernel + one (hout*wout,Cin)@(Cin,Cout)
# matmul.  The f32 accumulator is seeded with a precomputed bias map
# (projection bias only at in-bounds taps + conv bias), which keeps the
# zero-padding semantics of "pad AFTER projection" exact.
# ---------------------------------------------------------------------------
def _make_downconv_kernel(hout, wout):
    hw_out = hout * wout

    def kernel(xg_ref, wf_ref, bmap_ref, o_ref):
        acc = bmap_ref[...]                                # (hw_out, Cout) f32 seed
        for t in range(9):                                 # static unroll over taps
            ky, kx = divmod(t, 3)
            q = (ky % 2) * 3 + kx                          # phase plane
            dy = (ky // 2) * wout                          # contiguous row offset
            g = xg_ref[0, q, dy:dy + hw_out, :]            # (hw_out, Cin)
            acc = acc + jnp.dot(g, wf_ref[t], preferred_element_type=jnp.float32)
        o_ref[0] = acc.astype(o_ref.dtype)

    return kernel


def _proj_downconv(x_nhwc, op, compute_dtype, out_dtype):
    N, h, w, cin = x_nhwc.shape
    cout = op['cout']
    hout, wout = (h - 1) // 2 + 1, (w - 1) // 2 + 1
    hw_out = hout * wout
    Hp, Wp = 2 * (hout + 1), 2 * wout + 2                  # padded extents (even)

    # zero-pad once (conv pad=1 plus extra zero rows/cols so every tap window exists).
    xp = jnp.pad(x_nhwc, ((0, 0), (1, Hp - h - 1), (1, Wp - w - 1), (0, 0)))
    # phase decomposition: xg[n, py*3+kx, ry*wout+p, :] == xp[n, 2*ry+py, 2*p+kx, :]
    xc = jnp.stack([xp[:, :, kx:kx + 2 * wout:2, :] for kx in range(3)], axis=1)
    xg = jnp.stack([xc[:, :, py::2, :, :] for py in range(2)], axis=1)
    xg = xg.reshape(N, 6, (hout + 1) * wout, cin).astype(compute_dtype)

    # bias map: projection bias contributes only where the tap hits a real pixel.
    ks = jnp.arange(3)
    oo, pp = jnp.arange(hout), jnp.arange(wout)
    row_ok = ((2 * oo[None, :] + ks[:, None] >= 1) &
              (2 * oo[None, :] + ks[:, None] <= h)).astype(jnp.float32)   # (3, hout)
    col_ok = ((2 * pp[None, :] + ks[:, None] >= 1) &
              (2 * pp[None, :] + ks[:, None] <= w)).astype(jnp.float32)   # (3, wout)
    inb = (row_ok[:, None, :, None] * col_ok[None, :, None, :]).reshape(9, hw_out)
    bias_map = jnp.einsum('to,td->od', inb, op['bpw']) + op['b3'][None, :]  # (hw_out,Cout) f32

    wf = op['wf']                                          # (9, cin, cout) cdt

    def build(single_buffer):
        const = _const_spec_factory(single_buffer)
        return pl.pallas_call(
            _make_downconv_kernel(hout, wout),
            out_shape=jax.ShapeDtypeStruct((N, hw_out, cout), out_dtype),
            grid_spec=pltpu.PrefetchScalarGridSpec(
                num_scalar_prefetch=0,
                grid=(N,),  # NOTE: one image per step; fine for N>=2, no megacore split at N=1.
                in_specs=[
                    pl.BlockSpec((1, 6, (hout + 1) * wout, cin), lambda n: (n, 0, 0, 0)),
                    const((9, cin, cout), lambda n: (0, 0, 0)),
                    const((hw_out, cout), lambda n: (0, 0)),
                ],
                out_specs=pl.BlockSpec((1, hw_out, cout), lambda n: (n, 0, 0))),
            compiler_params=_compiler_params())

    out = _call_with_fallback(build, xg, wf, bias_map)
    return out.reshape(N, hout, wout, cout)


# ---------------------------------------------------------------------------
# Fused-operand precompute (hoisted out of the hot path), parameters, forward.
# ---------------------------------------------------------------------------
def precompute_stage_operands(params, compute_dtype=jnp.bfloat16):
    """Fold the 1x1 projection into each resize layer's weights (do this once)."""
    ops = []
    for p in params:
        wp, bp = p['wp'], p['bp']
        cin, cout = wp.shape
        if p['resize'] == 'deconv':
            s, wd, bd = p['s'], p['wd'], p['bd']
            # Wf[cin, (di,dj,d)] = sum_c Wp[cin,c] * Wd[c,d,di,dj]
            wf = jnp.einsum('ic,cdab->iabd', wp, wd).reshape(cin, s * s * cout)
            bf = (jnp.einsum('c,cdab->abd', bp, wd) + bd[None, None, :]).reshape(1, s * s * cout)
            ops.append(dict(kind='expand', s=s, cout=cout,
                            wf=wf.astype(compute_dtype), bf=bf.astype(jnp.float32)))
        elif p['resize'] == 'identity':
            ops.append(dict(kind='expand', s=1, cout=cout,
                            wf=wp.astype(compute_dtype),
                            bf=bp.reshape(1, cout).astype(jnp.float32)))
        else:  # 'conv3s2'
            w3, b3 = p['w3'], p['b3']
            w3t = w3.reshape(9, cout, cout)                       # tap order ky*3+kx (HWIO)
            wf = jnp.einsum('ic,tcd->tid', wp, w3t)               # (9, cin, cout)
            bpw = jnp.einsum('c,tcd->td', bp, w3t)                # (9, cout)
            ops.append(dict(kind='downconv', cout=cout,
                            wf=wf.astype(compute_dtype),
                            bpw=bpw.astype(jnp.float32),
                            b3=b3.astype(jnp.float32)))
    return ops


def init_reassemble_params(key, in_channels, out_channels):
    keys = iter(jax.random.split(key, 16))

    def kaiming(k, shape, fan_out):
        return jnp.sqrt(2.0 / float(fan_out)) * jax.random.normal(k, shape, jnp.float32)

    params = []
    for i, co in enumerate(out_channels):
        p = {
            'wp': kaiming(next(keys), (in_channels, co), fan_out=co),
            # randomized (ConvModule would zero it) so the bias path is exercised.
            'bp': 0.1 * jax.random.normal(next(keys), (co,), jnp.float32),
        }
        if i in (0, 1):
            s = 4 if i == 0 else 2
            p.update(resize='deconv', s=s,
                     wd=0.1 * jax.random.normal(next(keys), (co, co, s, s), jnp.float32),
                     bd=0.1 * jax.random.normal(next(keys), (co,), jnp.float32))
        elif i == 2:
            p['resize'] = 'identity'
        else:
            p.update(resize='conv3s2',
                     w3=kaiming(next(keys), (3, 3, co, co), fan_out=co * 9),   # HWIO
                     b3=0.1 * jax.random.normal(next(keys), (co,), jnp.float32))
        params.append(p)
    return params


def reassemble_blocks_forward_nhwc(inputs, params, readout_type='ignore',
                                   compute_dtype=jnp.bfloat16, out_dtype=None,
                                   operands=None):
    """inputs: list of (x (N,h,w,Cin) NHWC, cls_token (N,Cin)).  Returns list of NHWC."""
    # TODO(synk): readout_type 'add' and 'project' (Linear+GELU on [tok; cls]) not implemented;
    # module default 'ignore' simply drops the cls token.
    assert readout_type == 'ignore'
    if operands is None:
        operands = precompute_stage_operands(params, compute_dtype)
    outs = []
    for (x, _cls), op in zip(inputs, operands):
        odt = x.dtype if out_dtype is None else out_dtype
        if op['kind'] == 'expand':
            outs.append(_proj_expand(x, op, compute_dtype, odt))
        else:
            outs.append(_proj_downconv(x, op, compute_dtype, odt))
    return outs


def reassemble_blocks_forward(inputs, params, readout_type='ignore',
                              compute_dtype=jnp.bfloat16, out_dtype=None):
    """NCHW-in / NCHW-out wrapper mirroring the PyTorch module.  Prefer the NHWC
    entry point end-to-end (each transpose here is an extra HBM round trip)."""
    nhwc_inputs = [(jnp.transpose(x, (0, 2, 3, 1)), cls) for x, cls in inputs]
    outs = reassemble_blocks_forward_nhwc(nhwc_inputs, params, readout_type=readout_type,
                                          compute_dtype=compute_dtype, out_dtype=out_dtype)
    return [jnp.transpose(o, (0, 3, 1, 2)) for o in outs]


# ---------------------------------------------------------------------------
# Pure-JAX reference (full f32, un-fused proj -> resize), for the self-check.
# ---------------------------------------------------------------------------
def _reassemble_ref(inputs, params):
    outs = []
    for (x_nchw, _cls), p in zip(inputs, params):
        x = jnp.transpose(x_nchw, (0, 2, 3, 1))
        y = jnp.einsum('nhwc,cd->nhwd', x, p['wp']) + p['bp']
        if p['resize'] == 'deconv':
            s = p['s']
            t = jnp.einsum('nijc,cdab->niajbd', y, p['wd'])
            N, hh, _, ww, _, co = t.shape
            out = t.reshape(N, hh * s, ww * s, co) + p['bd']
        elif p['resize'] == 'identity':
            out = y
        else:
            out = lax.conv_general_dilated(
                y, p['w3'], window_strides=(2, 2), padding=((1, 1), (1, 1)),
                dimension_numbers=('NHWC', 'HWIO', 'NHWC')) + p['b3']
        outs.append(jnp.transpose(out, (0, 3, 1, 2)))
    return outs


if __name__ == "__main__":
    key = jax.random.PRNGKey(0)
    k_par, *k_in = jax.random.split(key, 9)

    N, Cin, h, w = 2, 64, 8, 8
    out_channels = [16, 32, 64, 128]
    params = init_reassemble_params(k_par, Cin, out_channels)

    inputs = []
    for i in range(4):
        x = jax.random.normal(k_in[2 * i], (N, Cin, h, w), jnp.float32)
        cls = jax.random.normal(k_in[2 * i + 1], (N, Cin), jnp.float32)
        inputs.append((x, cls))

    expected = [(N, out_channels[0], 4 * h, 4 * w),
                (N, out_channels[1], 2 * h, 2 * w),
                (N, out_channels[2], h, w),
                (N, out_channels[3], (h - 1) // 2 + 1, (w - 1) // 2 + 1)]

    refs = jax.block_until_ready(_reassemble_ref(inputs, params))

    # f32 compute path (tolerance allows for reduced-precision MXU passes on either side).
    outs_f32 = jax.block_until_ready(
        reassemble_blocks_forward(inputs, params, compute_dtype=jnp.float32))
    for o, es in zip(outs_f32, expected):
        assert o.shape == es, (o.shape, es)
    for o, r in zip(outs_f32, refs):
        np.testing.assert_allclose(np.asarray(o, np.float32), np.asarray(r),
                                   atol=6e-2, rtol=6e-2)

    # bf16 compute path (recommended: fast MXU path, halved VMEM/HBM traffic).
    outs_bf16 = jax.block_until_ready(
        reassemble_blocks_forward(inputs, params, compute_dtype=jnp.bfloat16))
    for o, es in zip(outs_bf16, expected):
        assert o.shape == es, (o.shape, es)
    for o, r in zip(outs_bf16, refs):
        np.testing.assert_allclose(np.asarray(o, np.float32), np.asarray(r),
                                   atol=1.5e-1, rtol=1e-1)

    print("KERNEL_OK")
</pallas_src>

<mosaic_0001>
module attributes {stable_mosaic.version = 11 : i64} {
  func.func @kernel(%arg0: i32, %arg1: memref<16x8x64xf32, #tpu.memory_space<vmem>>, %arg2: memref<64x256xf32, #tpu.memory_space<vmem>>, %arg3: memref<1x256xf32, #tpu.memory_space<vmem>>, %arg4: memref<16x4x8x64xf32, #tpu.memory_space<vmem>>) attributes {dimension_semantics = [#tpu.dimension_semantics<parallel>], iteration_bounds = array<i64: 1>, scalar_prefetch = 0 : i64, scratch_operands = 0 : i64, tpu.core_type = #tpu.core_type<tc>, window_params = [{transform_indices = @transform_0, window_bounds = array<i64: 16, 8, 64>}, {pipeline_mode = #tpu.pipeline_mode<synchronous>, transform_indices = @transform_1, window_bounds = array<i64: 64, 256>}, {pipeline_mode = #tpu.pipeline_mode<synchronous>, transform_indices = @transform_2, window_bounds = array<i64: 1, 256>}, {transform_indices = @transform_3, window_bounds = array<i64: 16, 4, 8, 64>}]} {
    %c0 = arith.constant 0 : index
    %c0_0 = arith.constant 0 : index
    %c0_1 = arith.constant 0 : index
    %0 = vector.load %arg1[%c0, %c0_0, %c0_1] : memref<16x8x64xf32, #tpu.memory_space<vmem>>, vector<16x8x64xf32>
    %1 = vector.shape_cast %0 : vector<16x8x64xf32> to vector<128x64xf32>
    %c0_2 = arith.constant 0 : index
    %c0_3 = arith.constant 0 : index
    %2 = vector.load %arg2[%c0_2, %c0_3] : memref<64x256xf32, #tpu.memory_space<vmem>>, vector<64x256xf32>
    %cst = arith.constant dense<0.000000e+00> : vector<128x256xf32>
    %3 = tpu.matmul %1, %2, %cst {dimension_numbers = #tpu.dot_dimension_numbers<[1], [0], [0], [1], [0, 0, 1, 1], [], []>} : vector<128x64xf32>, vector<64x256xf32>, vector<128x256xf32> -> vector<128x256xf32>
    %c0_4 = arith.constant 0 : index
    %c0_5 = arith.constant 0 : index
    %4 = vector.load %arg3[%c0_4, %c0_5] : memref<1x256xf32, #tpu.memory_space<vmem>>, vector<1x256xf32>
    %5 = vector.shape_cast %4 : vector<1x256xf32> to vector<256xf32>
    %6 = vector.shape_cast %5 : vector<256xf32> to vector<1x256xf32>
    %7 = vector.broadcast %6 : vector<1x256xf32> to vector<128x256xf32>
    %8 = arith.addf %3, %7 : vector<128x256xf32>
    %9 = vector.extract_strided_slice %8 {offsets = [0, 0], sizes = [128, 64], strides = [1, 1]} : vector<128x256xf32> to vector<128x64xf32>
    %10 = vector.shape_cast %9 : vector<128x64xf32> to vector<16x8x64xf32>
    %c0_6 = arith.constant 0 : index
    %c0_7 = arith.constant 0 : index
    %c0_8 = arith.constant 0 : index
    %c0_9 = arith.constant 0 : index
    %11 = vector.load %arg4[%c0_6, %c0_7, %c0_8, %c0_9] : memref<16x4x8x64xf32, #tpu.memory_space<vmem>>, vector<16x1x8x64xf32>
    %12 = vector.shape_cast %11 : vector<16x1x8x64xf32> to vector<16x8x64xf32>
    %13 = vector.shape_cast %10 : vector<16x8x64xf32> to vector<16x1x8x64xf32>
    tpu.vector_store %arg4[%c0_6, %c0_7, %c0_8, %c0_9], %13 {strides = array<i32>} : memref<16x4x8x64xf32, #tpu.memory_space<vmem>>, vector<16x1x8x64xf32>,
    %14 = vector.extract_strided_slice %8 {offsets = [0, 64], sizes = [128, 64], strides = [1, 1]} : vector<128x256xf32> to vector<128x64xf32>
    %15 = vector.shape_cast %14 : vector<128x64xf32> to vector<16x8x64xf32>
    %c0_10 = arith.constant 0 : index
    %c1 = arith.constant 1 : index
    %c0_11 = arith.constant 0 : index
    %c0_12 = arith.constant 0 : index
    %16 = vector.load %arg4[%c0_10, %c1, %c0_11, %c0_12] : memref<16x4x8x64xf32, #tpu.memory_space<vmem>>, vector<16x1x8x64xf32>
    %17 = vector.shape_cast %16 : vector<16x1x8x64xf32> to vector<16x8x64xf32>
    %18 = vector.shape_cast %15 : vector<16x8x64xf32> to vector<16x1x8x64xf32>
    tpu.vector_store %arg4[%c0_10, %c1, %c0_11, %c0_12], %18 {strides = array<i32>} : memref<16x4x8x64xf32, #tpu.memory_space<vmem>>, vector<16x1x8x64xf32>,
    %19 = vector.extract_strided_slice %8 {offsets = [0, 128], sizes = [128, 64], strides = [1, 1]} : vector<128x256xf32> to vector<128x64xf32>
    %20 = vector.shape_cast %19 : vector<128x64xf32> to vector<16x8x64xf32>
    %c0_13 = arith.constant 0 : index
    %c2 = arith.constant 2 : index
    %c0_14 = arith.constant 0 : index
    %c0_15 = arith.constant 0 : index
    %21 = vector.load %arg4[%c0_13, %c2, %c0_14, %c0_15] : memref<16x4x8x64xf32, #tpu.memory_space<vmem>>, vector<16x1x8x64xf32>
    %22 = vector.shape_cast %21 : vector<16x1x8x64xf32> to vector<16x8x64xf32>
    %23 = vector.shape_cast %20 : vector<16x8x64xf32> to vector<16x1x8x64xf32>
    tpu.vector_store %arg4[%c0_13, %c2, %c0_14, %c0_15], %23 {strides = array<i32>} : memref<16x4x8x64xf32, #tpu.memory_space<vmem>>, vector<16x1x8x64xf32>,
    %24 = vector.extract_strided_slice %8 {offsets = [0, 192], sizes = [128, 64], strides = [1, 1]} : vector<128x256xf32> to vector<128x64xf32>
    %25 = vector.shape_cast %24 : vector<128x64xf32> to vector<16x8x64xf32>
    %c0_16 = arith.constant 0 : index
    %c3 = arith.constant 3 : index
    %c0_17 = arith.constant 0 : index
    %c0_18 = arith.constant 0 : index
    %26 = vector.load %arg4[%c0_16, %c3, %c0_17, %c0_18] : memref<16x4x8x64xf32, #tpu.memory_space<vmem>>, vector<16x1x8x64xf32>
    %27 = vector.shape_cast %26 : vector<16x1x8x64xf32> to vector<16x8x64xf32>
    %28 = vector.shape_cast %25 : vector<16x8x64xf32> to vector<16x1x8x64xf32>
    tpu.vector_store %arg4[%c0_16, %c3, %c0_17, %c0_18], %28 {strides = array<i32>} : memref<16x4x8x64xf32, #tpu.memory_space<vmem>>, vector<16x1x8x64xf32>,
    return
  }
  func.func @transform_0(%arg0: i32) -> (i32, i32, i32) {
    %c0_i32 = arith.constant 0 : i32
    %c0_i32_0 = arith.constant 0 : i32
    %c0_i32_1 = arith.constant 0 : i32
    return %arg0, %c0_i32, %c0_i32_0 : i32, i32, i32
  }
  func.func @transform_1(%arg0: i32) -> (i32, i32) {
    %c0_i32 = arith.constant 0 : i32
    %c0_i32_0 = arith.constant 0 : i32
    %c0_i32_1 = arith.constant 0 : i32
    return %c0_i32, %c0_i32_0 : i32, i32
  }
  func.func @transform_2(%arg0: i32) -> (i32, i32) {
    %c0_i32 = arith.constant 0 : i32
    %c0_i32_0 = arith.constant 0 : i32
    %c0_i32_1 = arith.constant 0 : i32
    return %c0_i32, %c0_i32_0 : i32, i32
  }
  func.func @transform_3(%arg0: i32) -> (i32, i32, i32, i32) {
    %c0_i32 = arith.constant 0 : i32
    %c0_i32_0 = arith.constant 0 : i32
    %c0_i32_1 = arith.constant 0 : i32
    %c0_i32_2 = arith.constant 0 : i32
    return %arg0, %c0_i32, %c0_i32_0, %c0_i32_1 : i32, i32, i32, i32
  }
}

module attributes {stable_mosaic.version = 11 : i64} {
  func.func @kernel(%arg0: i32, %arg1: memref<16x8x64xf32, #tpu.memory_space<vmem>>, %arg2: memref<64x256xf32, #tpu.memory_space<vmem>>, %arg3: memref<1x256xf32, #tpu.memory_space<vmem>>, %arg4: memref<16x4x8x64xf32, #tpu.memory_space<vmem>>) attributes {dimension_semantics = [#tpu.dimension_semantics<parallel>], iteration_bounds = array<i64: 1>, scalar_prefetch = 0 : i64, scratch_operands = 0 : i64, tpu.core_type = #tpu.core_type<tc>, window_params = [{transform_indices = @transform_0, window_bounds = array<i64: 16, 8, 64>}, {pipeline_mode = #tpu.pipeline_mode<synchronous>, transform_indices = @transform_1, window_bounds = array<i64: 64, 256>}, {pipeline_mode = #tpu.pipeline_mode<synchronous>, transform_indices = @transform_2, window_bounds = array<i64: 1, 256>}, {transform_indices = @transform_3, window_bounds = array<i64: 16, 4, 8, 64>}]} {
    %c0 = arith.constant 0 : index
    %c0_0 = arith.constant 0 : index
    %c0_1 = arith.constant 0 : index
    %0 = vector.load %arg1[%c0, %c0_0, %c0_1] : memref<16x8x64xf32, #tpu.memory_space<vmem>>, vector<16x8x64xf32>
    %1 = vector.shape_cast %0 : vector<16x8x64xf32> to vector<128x64xf32>
    %c0_2 = arith.constant 0 : index
    %c0_3 = arith.constant 0 : index
    %2 = vector.load %arg2[%c0_2, %c0_3] : memref<64x256xf32, #tpu.memory_space<vmem>>, vector<64x256xf32>
    %cst = arith.constant dense<0.000000e+00> : vector<128x256xf32>
    %3 = tpu.matmul %1, %2, %cst {dimension_numbers = #tpu.dot_dimension_numbers<[1], [0], [0], [1], [0, 0, 1, 1], [], []>} : vector<128x64xf32>, vector<64x256xf32>, vector<128x256xf32> -> vector<128x256xf32>
    %c0_4 = arith.constant 0 : index
    %c0_5 = arith.constant 0 : index
    %4 = vector.load %arg3[%c0_4, %c0_5] : memref<1x256xf32, #tpu.memory_space<vmem>>, vector<1x256xf32>
    %5 = vector.shape_cast %4 : vector<1x256xf32> to vector<256xf32>
    %6 = vector.shape_cast %5 : vector<256xf32> to vector<1x256xf32>
    %7 = vector.broadcast %6 : vector<1x256xf32> to vector<128x256xf32>
    %8 = arith.addf %3, %7 : vector<128x256xf32>
    %9 = vector.extract_strided_slice %8 {offsets = [0, 0], sizes = [128, 64], strides = [1, 1]} : vector<128x256xf32> to vector<128x64xf32>
    %10 = vector.shape_cast %9 : vector<128x64xf32> to vector<16x8x64xf32>
    %c0_6 = arith.constant 0 : index
    %c0_7 = arith.constant 0 : index
    %c0_8 = arith.constant 0 : index
    %c0_9 = arith.constant 0 : index
    %11 = vector.load %arg4[%c0_6, %c0_7, %c0_8, %c0_9] : memref<16x4x8x64xf32, #tpu.memory_space<vmem>>, vector<16x1x8x64xf32>
    %12 = vector.shape_cast %11 : vector<16x1x8x64xf32> to vector<16x8x64xf32>
    %13 = vector.shape_cast %10 : vector<16x8x64xf32> to vector<16x1x8x64xf32>
    tpu.vector_store %arg4[%c0_6, %c0_7, %c0_8, %c0_9], %13 {strides = array<i32>} : memref<16x4x8x64xf32, #tpu.memory_space<vmem>>, vector<16x1x8x64xf32>,
    %14 = vector.extract_strided_slice %8 {offsets = [0, 64], sizes = [128, 64], strides = [1, 1]} : vector<128x256xf32> to vector<128x64xf32>
    %15 = vector.shape_cast %14 : vector<128x64xf32> to vector<16x8x64xf32>
    %c0_10 = arith.constant 0 : index
    %c1 = arith.constant 1 : index
    %c0_11 = arith.constant 0 : index
    %c0_12 = arith.constant 0 : index
    %16 = vector.load %arg4[%c0_10, %c1, %c0_11, %c0_12] : memref<16x4x8x64xf32, #tpu.memory_space<vmem>>, vector<16x1x8x64xf32>
    %17 = vector.shape_cast %16 : vector<16x1x8x64xf32> to vector<16x8x64xf32>
    %18 = vector.shape_cast %15 : vector<16x8x64xf32> to vector<16x1x8x64xf32>
    tpu.vector_store %arg4[%c0_10, %c1, %c0_11, %c0_12], %18 {strides = array<i32>} : memref<16x4x8x64xf32, #tpu.memory_space<vmem>>, vector<16x1x8x64xf32>,
    %19 = vector.extract_strided_slice %8 {offsets = [0, 128], sizes = [128, 64], strides = [1, 1]} : vector<128x256xf32> to vector<128x64xf32>
    %20 = vector.shape_cast %19 : vector<128x64xf32> to vector<16x8x64xf32>
    %c0_13 = arith.constant 0 : index
    %c2 = arith.constant 2 : index
    %c0_14 = arith.constant 0 : index
    %c0_15 = arith.constant 0 : index
    %21 = vector.load %arg4[%c0_13, %c2, %c0_14, %c0_15] : memref<16x4x8x64xf32, #tpu.memory_space<vmem>>, vector<16x1x8x64xf32>
    %22 = vector.shape_cast %21 : vector<16x1x8x64xf32> to vector<16x8x64xf32>
    %23 = vector.shape_cast %20 : vector<16x8x64xf32> to vector<16x1x8x64xf32>
    tpu.vector_store %arg4[%c0_13, %c2, %c0_14, %c0_15], %23 {strides = array<i32>} : memref<16x4x8x64xf32, #tpu.memory_space<vmem>>, vector<16x1x8x64xf32>,
    %24 = vector.extract_strided_slice %8 {offsets = [0, 192], sizes = [128, 64], strides = [1, 1]} : vector<128x256xf32> to vector<128x64xf32>
    %25 = vector.shape_cast %24 : vector<128x64xf32> to vector<16x8x64xf32>
    %c0_16 = arith.constant 0 : index
    %c3 = arith.constant 3 : index
    %c0_17 = arith.constant 0 : index
    %c0_18 = arith.constant 0 : index
    %26 = vector.load %arg4[%c0_16, %c3, %c0_17, %c0_18] : memref<16x4x8x64xf32, #tpu.memory_space<vmem>>, vector<16x1x8x64xf32>
    %27 = vector.shape_cast %26 : vector<16x1x8x64xf32> to vector<16x8x64xf32>
    %28 = vector.shape_cast %25 : vector<16x8x64xf32> to vector<16x1x8x64xf32>
    tpu.vector_store %arg4[%c0_16, %c3, %c0_17, %c0_18], %28 {strides = array<i32>} : memref<16x4x8x64xf32, #tpu.memory_space<vmem>>, vector<16x1x8x64xf32>,
    return
  }
  func.func @transform_0(%arg0: i32) -> (i32, i32, i32) {
    %c0_i32 = arith.constant 0 : i32
    %c0_i32_0 = arith.constant 0 : i32
    %c0_i32_1 = arith.constant 0 : i32
    return %arg0, %c0_i32, %c0_i32_0 : i32, i32, i32
  }
  func.func @transform_1(%arg0: i32) -> (i32, i32) {
    %c0_i32 = arith.constant 0 : i32
    %c0_i32_0 = arith.constant 0 : i32
    %c0_i32_1 = arith.constant 0 : i32
    return %c0_i32, %c0_i32_0 : i32, i32
  }
  func.func @transform_2(%arg0: i32) -> (i32, i32) {
    %c0_i32 = arith.constant 0 : i32
    %c0_i32_0 = arith.constant 0 : i32
    %c0_i32_1 = arith.constant 0 : i32
    return %c0_i32, %c0_i32_0 : i32, i32
  }
  func.func @transform_3(%arg0: i32) -> (i32, i32, i32, i32) {
    %c0_i32 = arith.constant 0 : i32
    %c0_i32_0 = arith.constant 0 : i32
    %c0_i32_1 = arith.constant 0 : i32
    %c0_i32_2 = arith.constant 0 : i32
    return %arg0, %c0_i32, %c0_i32_0, %c0_i32_1 : i32, i32, i32, i32
  }
}

</mosaic_0001>

<bundles_post_ra>
// kernel: tpu_custom_call.1
= control target key start
LH: loop header
LB: loop body
LE: loop exit
PB: predicated region body
PF: predicated region fallthrough
CT: control target
= control target key end

     0   :  { %8 = vsyncpa [#allocation3], 0  ;;  %s832_s0 = inlined_call_operand.hbm [shape: f32[16,8,64], index: 0, kind: input, shape index: {}]   ;;  %s833_s1 = inlined_call_operand.hbm [shape: f32[64,256], index: 1, kind: input, shape index: {}]   ;;  %s834_s2 = inlined_call_operand.vmem [shape: f32[1,256], index: 2, kind: input, shape index: {}]   ;;  %s835_s3 = inlined_call_operand.hbm [shape: f32[16,4,8,64], index: 3, kind: output, shape index: {}]  }
   0x1   :  { %9 = vsyncpa [#allocation6], 0 }
   0x2   :  { %10 = vsyncpa [#allocation4], 0  ;;  %s617_s12 = smov [#allocation2]  }
   0x3   :  { %s16_s13 = sshll.u32 %s617_s12, 4  ;;  %s17_s13 = int_to_ptr.vmem [resolvable:$true] %s16_s13 }
   0x4   :  { %s559_s14 = scalar_lea.vmem %s17_s13, 2048  ;;  %p564_p1 = scmp.lt.s32.totalorder %s17_s13, %s17_s13 }
   0x5   :  { %p560_p0 = scmp.ne.s32.totalorder %s17_s13, %s559_s14  ;;  %p565_p2 = scmp.lt.s32.totalorder %s559_s14, %s559_s14 }
   0x7   :  { %p566_p3 = por %p565_p2, %p564_p1 }
   0x9   :  { %p567_p4 = pnand %p566_p3, %p560_p0 }
   0xb   :  { %570 = shalt.err (!%p567_p4)
}
   0xc   :  { %s618_s15 = smov 128   ;;  %s619_s16 = smov 8  }
   0xd   :  { %22 = dma.hbm_to_vmem [thread:$0]  %s832_s0, 2048, %s17_s13, [#allocation3], %s618_s15, %s618_s15, %s619_s16  }
   0xe   :  { %s620_s19 = smov [#allocation5]  }
   0xf   :  { %s28_s20 = sshll.u32 %s620_s19, 4  ;;  %s29_s20 = int_to_ptr.vmem [resolvable:$true] %s28_s20 }
  0x10   :  { %s579_s21 = scalar_lea.vmem %s29_s20, 2048  ;;  %p584_p6 = scmp.lt.s32.totalorder %s29_s20, %s29_s20 }
  0x11   :  { %p580_p5 = scmp.ne.s32.totalorder %s29_s20, %s579_s21  ;;  %p585_p7 = scmp.lt.s32.totalorder %s579_s21, %s579_s21 }
  0x13   :  { %p586_p8 = por %p585_p7, %p584_p6 }
  0x15   :  { %p587_p9 = pnand %p586_p8, %p580_p5 }
  0x17   :  { %590 = shalt.err (!%p587_p9)
}
  0x18   :  { %s621_s22 = smov 256   ;;  %s622_s23 = smov 16  }
  0x19   :  { %34 = dma.hbm_to_vmem [thread:$0]  %s833_s1, 2048, %s29_s20, [#allocation6], %s621_s22, %s621_s22, %s622_s23  }
  0x1a   :  { %611 = dma.done.wait [#allocation3], 2048  }
  0x1b   :  { %612 = vsyncadd [#allocation3], 4294965248 }
  0x1c   :  { %613 = dma.done.wait [#allocation6], 2048  }
  0x1d   :  { %614 = vsyncadd [#allocation6], 4294965248  ;;  %v623_v0 = vmov 0.0   ;;  %v74_v1 = vld [vmem:[#allocation5 + $0x78] sm:$0xff]  ;;  %v73_v2 = vld [vmem:[#allocation5 + $0x70] sm:$0xff]  ;;  %vm87_vm0 = vcmask 523264   ;;  %v77_v33 = vlaneseq }
  0x1e   :  { %200 = vmatprep.mubr.f32.mxu0 %v623_v0  ;;  %248 = vmatprep.mubr.f32.mxu1 %v623_v0  ;;  %v72_v3 = vld [vmem:[#allocation5 + $0x68] sm:$0xff]  ;;  %v71_v4 = vld [vmem:[#allocation5 + $0x60] sm:$0xff]  ;;  %v70_v5 = vld [vmem:[#allocation5 + $0x58] sm:$0xff]  ;;  %s625_s26 = smov [#allocation7]  }
  0x1f   :  { %152 = vmatprep.subr.mxu0 %v74_v1  ;;  %526 = vmatprep.subr.mxu1 %v74_v1  ;;  %v69_v6 = vld [vmem:[#allocation5 + $0x50] sm:$0xff]  ;;  %v68_v7 = vld [vmem:[#allocation5 + $0x48] sm:$0xff]  ;;  %v67_v8 = vld [vmem:[#allocation5 + $0x40] sm:$0xff]  ;;  %v78_v34 = vshrl.u32 %v77_v33, 7  ;;  %s497_s27 = sshll.u32 %s625_s26, 4  ;;  %s498_s27 = int_to_ptr.vmem [resolvable:$true] %s497_s27 }
  0x20   :  { %153 = vmatpush1.msra.mxu0 %v73_v2  ;;  %534 = vmatpush1.msra.mxu1 %v73_v2  ;;  %v66_v9 = vld [vmem:[#allocation5 + $0x38] sm:$0xff]  ;;  %v65_v10 = vld [vmem:[#allocation5 + $0x30] sm:$0xff]  ;;  %v64_v11 = vld [vmem:[#allocation5 + $0x28] sm:$0xff]  ;;  %s591_s28 = scalar_lea.vmem %s498_s27, 8192  ;;  %p596_p11 = scmp.lt.s32.totalorder %s498_s27, %s498_s27 }
  0x21   :  { %154 = vmatprep.subr.mxu0 %v72_v3  ;;  %527 = vmatprep.subr.mxu1 %v72_v3  ;;  %v63_v12 = vld [vmem:[#allocation5 + $0x20] sm:$0xff]  ;;  %v62_v13 = vld [vmem:[#allocation5 + $0x18] sm:$0xff]  ;;  %v61_v14 = vld [vmem:[#allocation5 + $0x10] sm:$0xff]  ;;  %v79_v35 = vsub.s32 0, %v78_v34  ;;  %v83_v37 = vsub.s32 1, %v78_v34  ;;  %p592_p10 = scmp.ne.s32.totalorder %s498_s27, %s591_s28  ;;  %p597_p12 = scmp.lt.s32.totalorder %s591_s28, %s591_s28 }
  0x22   :  { %155 = vmatpush1.msra.mxu0 %v71_v4  ;;  %535 = vmatpush1.msra.mxu1 %v71_v4  ;;  %v60_v15 = vld [vmem:[#allocation5 + $0x8] sm:$0xff]  ;;  %v59_v16 = vld [vmem:[#allocation5] sm:$0xff]  ;;  %v45_v21 = vld [vmem:[#allocation2 + $0x10] sm:$0xff] }
  0x23   :  { %156 = vmatprep.subr.mxu0 %v70_v5  ;;  %528 = vmatprep.subr.mxu1 %v70_v5  ;;  %v43_v17 = vld [vmem:[#allocation2] sm:$0xff]  ;;  %v44_v19 = vld [vmem:[#allocation2 + $0x8] sm:$0xff]  ;;  %v53_v22 = vld [vmem:[#allocation2 + $0x50] sm:$0xff]  ;;  %p598_p13 = por %p597_p12, %p596_p11 }
  0x24   :  { %157 = vmatpush1.msra.mxu0 %v69_v6  ;;  %536 = vmatpush1.msra.mxu1 %v69_v6  ;;  %v51_v18 = vld [vmem:[#allocation2 + $0x40] sm:$0xff]  ;;  %v52_v20 = vld [vmem:[#allocation2 + $0x48] sm:$0xff]  ;;  %v46_v23 = vld [vmem:[#allocation2 + $0x18] sm:$0xff] }
  0x25   :  { %158 = vmatprep.subr.mxu0 %v68_v7  ;;  %529 = vmatprep.subr.mxu1 %v68_v7  ;;  %v54_v24 = vld [vmem:[#allocation2 + $0x58] sm:$0xff]  ;;  %v47_v25 = vld [vmem:[#allocation2 + $0x20] sm:$0xff]  ;;  %v48_v27 = vld [vmem:[#allocation2 + $0x28] sm:$0xff]  ;;  %p599_p0 = pnand %p598_p13, %p592_p10 }
  0x26   :  { %159 = vmatpush1.msra.mxu0 %v67_v8  ;;  %537 = vmatpush1.msra.mxu1 %v67_v8  ;;  %v55_v26 = vld [vmem:[#allocation2 + $0x60] sm:$0xff]  ;;  %v56_v28 = vld [vmem:[#allocation2 + $0x68] sm:$0xff]  ;;  %v49_v29 = vld [vmem:[#allocation2 + $0x30] sm:$0xff] }
  0x27   :  { %160 = vmatprep.subr.mxu0 %v66_v9  ;;  %530 = vmatprep.subr.mxu1 %v66_v9  ;;  %v57_v30 = vld [vmem:[#allocation2 + $0x70] sm:$0xff]  ;;  %v50_v31 = vld [vmem:[#allocation2 + $0x38] sm:$0xff]  ;;  %v75_v36 = vld [vmem:[%s834_s2] sm:$0x3]  ;;  %s624_s2 = smov 64  }
  0x28   :  { %161 = vmatpush1.msra.mxu0 %v65_v10  ;;  %538 = vmatpush1.msra.mxu1 %v65_v10  ;;  %v58_v32 = vld [vmem:[#allocation2 + $0x78] sm:$0xff]  ;;  %v690_v38 = vrot.slane %v75_v36, %v79_v35  ;;  %v692_v39 = vrot.slane %v75_v36, %v83_v37 }
  0x29   :  { %162 = vmatprep.subr.mxu0 %v64_v11  ;;  %531 = vmatprep.subr.mxu1 %v64_v11 }
  0x2a   :  { %163 = vmatpush1.msra.mxu0 %v63_v12  ;;  %539 = vmatpush1.msra.mxu1 %v63_v12 }
  0x2b   :  { %164 = vmatprep.subr.mxu0 %v62_v13  ;;  %532 = vmatprep.subr.mxu1 %v62_v13 }
  0x2c   :  { %165 = vmatpush1.msra.mxu0 %v61_v14  ;;  %540 = vmatpush1.msra.mxu1 %v61_v14 }
  0x2d   :  { %166 = vmatprep.subr.mxu0 %v60_v15  ;;  %533 = vmatprep.subr.mxu1 %v60_v15 }
  0x2e   :  { %167 = vmatpush1.msra.mxu0 %v59_v16  ;;  %541 = vmatpush1.msra.mxu1 %v59_v16 }
  0x2f   :  { %510 = vmatmul.mubr.msk.f32.vlgmr.msra.gmra.mxu0 %vm87_vm0, %v43_v17  ;;  %518 = vmatmul.mubr.msk.f32.vlgmr.msra.gmra.mxu1 %vm87_vm0, %v51_v18 }
  0x30   :  { %206 = vmatprep.mubr.f32.mxu0 %v623_v0  ;;  %254 = vmatprep.mubr.f32.mxu1 %v623_v0 }
  0x33   :  { %511 = vmatmul.mubr.msk.f32.gmra.mxu0 %vm87_vm0, %v44_v19  ;;  %519 = vmatmul.mubr.msk.f32.gmra.mxu1 %vm87_vm0, %v52_v20 }
  0x34   :  { %212 = vmatprep.mubr.f32.mxu0 %v623_v0  ;;  %260 = vmatprep.mubr.f32.mxu1 %v623_v0 }
  0x37   :  { %512 = vmatmul.mubr.msk.f32.gmra.mxu0 %vm87_vm0, %v45_v21  ;;  %520 = vmatmul.mubr.msk.f32.gmra.mxu1 %vm87_vm0, %v53_v22 }
  0x38   :  { %218 = vmatprep.mubr.f32.mxu0 %v623_v0  ;;  %266 = vmatprep.mubr.f32.mxu1 %v623_v0 }
  0x3b   :  { %513 = vmatmul.mubr.msk.f32.gmra.mxu0 %vm87_vm0, %v46_v23  ;;  %521 = vmatmul.mubr.msk.f32.gmra.mxu1 %vm87_vm0, %v54_v24 }
  0x3c   :  { %224 = vmatprep.mubr.f32.mxu0 %v623_v0  ;;  %272 = vmatprep.mubr.f32.mxu1 %v623_v0 }
  0x3f   :  { %514 = vmatmul.mubr.msk.f32.gmra.mxu0 %vm87_vm0, %v47_v25  ;;  %522 = vmatmul.mubr.msk.f32.gmra.mxu1 %vm87_vm0, %v55_v26 }
  0x40   :  { %230 = vmatprep.mubr.f32.mxu0 %v623_v0  ;;  %278 = vmatprep.mubr.f32.mxu1 %v623_v0 }
  0x43   :  { %515 = vmatmul.mubr.msk.f32.gmra.mxu0 %vm87_vm0, %v48_v27  ;;  %523 = vmatmul.mubr.msk.f32.gmra.mxu1 %vm87_vm0, %v56_v28 }
  0x44   :  { %236 = vmatprep.mubr.f32.mxu0 %v623_v0  ;;  %284 = vmatprep.mubr.f32.mxu1 %v623_v0 }
  0x47   :  { %516 = vmatmul.mubr.msk.f32.gmra.mxu0 %vm87_vm0, %v49_v29  ;;  %524 = vmatmul.mubr.msk.f32.gmra.mxu1 %vm87_vm0, %v57_v30 }
  0x48   :  { %242 = vmatprep.mubr.f32.mxu0 %v623_v0  ;;  %290 = vmatprep.mubr.f32.mxu1 %v623_v0 }
  0x4b   :  { %517 = vmatmul.mubr.msk.f32.gmra.mxu0 %vm87_vm0, %v50_v31  ;;  %525 = vmatmul.mubr.msk.f32.gmra.mxu1 %vm87_vm0, %v58_v32 }
  0xef   :  { %v202_v40 = vpop.f32.mrf.mxu0  ;;  %v250_v41 = vpop.f32.mrf.mxu1 }
  0xf0   :  { %v203_v42 = vadd.f32 %v202_v40, %v690_v38  ;;  %v251_v43 = vadd.f32 %v250_v41, %v690_v38 }
  0xf1   :  { %v204_v44 = vpop.f32.mrf.mxu0  ;;  %v252_v45 = vpop.f32.mrf.mxu1 }
  0xf2   :  { %297 = vst.msk [vmem:[#allocation7] sm:$0xff] %vm87_vm0, %v203_v42  ;;  %305 = vst.msk [vmem:[#allocation7 + $0x100] sm:$0xff] %vm87_vm0, %v251_v43  ;;  %v205_v46 = vadd.f32 %v204_v44, %v692_v39  ;;  %v253_v47 = vadd.f32 %v252_v45, %v692_v39  ;;  %329 = vrot.lane.b32.xlu0 %v203_v42, %s624_s2 }
  0xf3   :  { %v208_v48 = vpop.f32.mrf.mxu0  ;;  %v256_v49 = vpop.f32.mrf.mxu1 }
  0xf4   :  { %395 = vst.msk [vmem:[#allocation7 + $0x10] sm:$0xff] %vm87_vm0, %v205_v46  ;;  %403 = vst.msk [vmem:[#allocation7 + $0x110] sm:$0xff] %vm87_vm0, %v253_v47  ;;  %v209_v50 = vadd.f32 %v208_v48, %v690_v38  ;;  %v257_v51 = vadd.f32 %v256_v49, %v690_v38 }
  0xf5   :  { %v210_v52 = vpop.f32.mrf.mxu0  ;;  %v258_v53 = vpop.f32.mrf.mxu1 }
  0xf6   :  { %298 = vst.msk [vmem:[#allocation7 + $0x20] sm:$0xff] %vm87_vm0, %v209_v50  ;;  %306 = vst.msk [vmem:[#allocation7 + $0x120] sm:$0xff] %vm87_vm0, %v257_v51  ;;  %v211_v54 = vadd.f32 %v210_v52, %v692_v39  ;;  %v259_v55 = vadd.f32 %v258_v53, %v692_v39  ;;  %347 = vrot.lane.b32.xlu1 %v257_v51, %s624_s2  ;;  %345 = vrot.lane.b32.xlu0 %v251_v43, %s624_s2 }
  0xf7   :  { %v214_v56 = vpop.f32.mrf.mxu0  ;;  %v262_v57 = vpop.f32.mrf.mxu1 }
  0xf8   :  { %396 = vst.msk [vmem:[#allocation7 + $0x30] sm:$0xff] %vm87_vm0, %v211_v54  ;;  %404 = vst.msk [vmem:[#allocation7 + $0x130] sm:$0xff] %vm87_vm0, %v259_v55  ;;  %v215_v58 = vadd.f32 %v214_v56, %v690_v38  ;;  %v263_v59 = vadd.f32 %v262_v57, %v690_v38 }
  0xf9   :  { %v216_v60 = vpop.f32.mrf.mxu0  ;;  %v264_v61 = vpop.f32.mrf.mxu1 }
  0xfa   :  { %429 = vrot.lane.b32.xlu1 %v211_v54, %s624_s2  ;;  %427 = vrot.lane.b32.xlu0 %v205_v46, %s624_s2  ;;  %299 = vst.msk [vmem:[#allocation7 + $0x40] sm:$0xff] %vm87_vm0, %v215_v58  ;;  %v217_v62 = vadd.f32 %v216_v60, %v692_v39  ;;  %307 = vst.msk [vmem:[#allocation7 + $0x140] sm:$0xff] %vm87_vm0, %v263_v59  ;;  %v721_v63 = vadd.f32 %v264_v61, %v692_v39 }
  0xfb   :  { %v220_v0 = vpop.f32.mrf.mxu0  ;;  %v268_v1 = vpop.f32.mrf.mxu1 }
  0xfc   :  { %397 = vst.msk [vmem:[#allocation7 + $0x50] sm:$0xff] %vm87_vm0, %v217_v62  ;;  %v221_v2 = vadd.f32 %v220_v0, %v690_v38  ;;  %405 = vst.msk [vmem:[#allocation7 + $0x150] sm:$0xff] %vm87_vm0, %v721_v63  ;;  %v269_v3 = vadd.f32 %v268_v1, %v690_v38 }
  0xfd   :  { %v222_v4 = vpop.f32.mrf.mxu0  ;;  %v270_v5 = vpop.f32.mrf.mxu1 }
  0xfe   :  { %445 = vrot.lane.b32.xlu1 %v259_v55, %s624_s2  ;;  %443 = vrot.lane.b32.xlu0 %v253_v47, %s624_s2  ;;  %300 = vst.msk [vmem:[#allocation7 + $0x60] sm:$0xff] %vm87_vm0, %v221_v2  ;;  %v223_v6 = vadd.f32 %v222_v4, %v692_v39  ;;  %308 = vst.msk [vmem:[#allocation7 + $0x160] sm:$0xff] %vm87_vm0, %v269_v3  ;;  %v271_v7 = vadd.f32 %v270_v5, %v692_v39 }
  0xff   :  { %v226_v8 = vpop.f32.mrf.mxu0  ;;  %v274_v9 = vpop.f32.mrf.mxu1 }
 0x100   :  { %398 = vst.msk [vmem:[#allocation7 + $0x70] sm:$0xff] %vm87_vm0, %v223_v6  ;;  %406 = vst.msk [vmem:[#allocation7 + $0x170] sm:$0xff] %vm87_vm0, %v271_v7  ;;  %v227_v10 = vadd.f32 %v226_v8, %v690_v38  ;;  %v275_v11 = vadd.f32 %v274_v9, %v690_v38 }
 0x101   :  { %v228_v12 = vpop.f32.mrf.mxu0  ;;  %v276_v13 = vpop.f32.mrf.mxu1 }
 0x102   :  { %333 = vrot.lane.b32.xlu1 %v215_v58, %s624_s2  ;;  %331 = vrot.lane.b32.xlu0 %v209_v50, %s624_s2  ;;  %301 = vst.msk [vmem:[#allocation7 + $0x80] sm:$0xff] %vm87_vm0, %v227_v10  ;;  %v229_v14 = vadd.f32 %v228_v12, %v692_v39  ;;  %309 = vst.msk [vmem:[#allocation7 + $0x180] sm:$0xff] %vm87_vm0, %v275_v11  ;;  %v277_v15 = vadd.f32 %v276_v13, %v692_v39 }
 0x103   :  { %v232_v16 = vpop.f32.mrf.mxu0  ;;  %v280_v17 = vpop.f32.mrf.mxu1 }
 0x104   :  { %399 = vst.msk [vmem:[#allocation7 + $0x90] sm:$0xff] %vm87_vm0, %v229_v14  ;;  %v233_v18 = vadd.f32 %v232_v16, %v690_v38  ;;  %407 = vst.msk [vmem:[#allocation7 + $0x190] sm:$0xff] %vm87_vm0, %v277_v15  ;;  %v281_v19 = vadd.f32 %v280_v17, %v690_v38 }
 0x105   :  { %v234_v20 = vpop.f32.mrf.mxu0  ;;  %v282_v21 = vpop.f32.mrf.mxu1 }
 0x106   :  { %335 = vrot.lane.b32.xlu1 %v221_v2, %s624_s2  ;;  %349 = vrot.lane.b32.xlu0 %v263_v59, %s624_s2  ;;  %302 = vst.msk [vmem:[#allocation7 + $0xa0] sm:$0xff] %vm87_vm0, %v233_v18  ;;  %v235_v22 = vadd.f32 %v234_v20, %v692_v39  ;;  %310 = vst.msk [vmem:[#allocation7 + $0x1a0] sm:$0xff] %vm87_vm0, %v281_v19  ;;  %v283_v23 = vadd.f32 %v282_v21, %v692_v39 }
 0x107   :  { %v238_v24 = vpop.f32.mrf.mxu0  ;;  %v286_v25 = vpop.f32.mrf.mxu1 }
 0x108   :  { %400 = vst.msk [vmem:[#allocation7 + $0xb0] sm:$0xff] %vm87_vm0, %v235_v22  ;;  %408 = vst.msk [vmem:[#allocation7 + $0x1b0] sm:$0xff] %vm87_vm0, %v283_v23  ;;  %v239_v26 = vadd.f32 %v238_v24, %v690_v38  ;;  %v287_v27 = vadd.f32 %v286_v25, %v690_v38 }
 0x109   :  { %v240_v28 = vpop.f32.mrf.mxu0  ;;  %v288_v29 = vpop.f32.mrf.mxu1 }
 0x10a   :  { %351 = vrot.lane.b32.xlu1 %v269_v3, %s624_s2  ;;  %431 = vrot.lane.b32.xlu0 %v217_v62, %s624_s2  ;;  %303 = vst.msk [vmem:[#allocation7 + $0xc0] sm:$0xff] %vm87_vm0, %v239_v26  ;;  %v241_v30 = vadd.f32 %v240_v28, %v692_v39  ;;  %311 = vst.msk [vmem:[#allocation7 + $0x1c0] sm:$0xff] %vm87_vm0, %v287_v27  ;;  %v289_v31 = vadd.f32 %v288_v29, %v692_v39 }
 0x10b   :  { %v244_v32 = vpop.f32.mrf.mxu0  ;;  %v292_v33 = vpop.f32.mrf.mxu1 }
 0x10c   :  { %401 = vst.msk [vmem:[#allocation7 + $0xd0] sm:$0xff] %vm87_vm0, %v241_v30  ;;  %v245_v34 = vadd.f32 %v244_v32, %v690_v38  ;;  %409 = vst.msk [vmem:[#allocation7 + $0x1d0] sm:$0xff] %vm87_vm0, %v289_v31  ;;  %v293_v35 = vadd.f32 %v292_v33, %v690_v38 }
 0x10d   :  { %v246_v36 = vpop.f32.mrf.mxu0  ;;  %v294_v37 = vpop.f32.mrf.mxu1 }
 0x10e   :  { %433 = vrot.lane.b32.xlu1 %v223_v6, %s624_s2  ;;  %447 = vrot.lane.b32.xlu0 %v721_v63, %s624_s2  ;;  %304 = vst.msk [vmem:[#allocation7 + $0xe0] sm:$0xff] %vm87_vm0, %v245_v34  ;;  %v247_v40 = vadd.f32 %v246_v36, %v692_v39  ;;  %312 = vst.msk [vmem:[#allocation7 + $0x1e0] sm:$0xff] %vm87_vm0, %v293_v35  ;;  %v295_v41 = vadd.f32 %v294_v37, %v692_v39 }
 0x110   :  { %402 = vst.msk [vmem:[#allocation7 + $0xf0] sm:$0xff] %vm87_vm0, %v247_v40  ;;  %410 = vst.msk [vmem:[#allocation7 + $0x1f0] sm:$0xff] %vm87_vm0, %v295_v41 }
 0x112   :  { %449 = vrot.lane.b32.xlu1 %v271_v7, %s624_s2  ;;  %337 = vrot.lane.b32.xlu0 %v227_v10, %s624_s2 }
 0x116   :  { %339 = vrot.lane.b32.xlu1 %v233_v18, %s624_s2  ;;  %353 = vrot.lane.b32.xlu0 %v275_v11, %s624_s2 }
 0x11a   :  { %355 = vrot.lane.b32.xlu1 %v281_v19, %s624_s2  ;;  %435 = vrot.lane.b32.xlu0 %v229_v14, %s624_s2 }
 0x11e   :  { %437 = vrot.lane.b32.xlu1 %v235_v22, %s624_s2  ;;  %451 = vrot.lane.b32.xlu0 %v277_v15, %s624_s2 }
 0x122   :  { %453 = vrot.lane.b32.xlu1 %v283_v23, %s624_s2  ;;  %341 = vrot.lane.b32.xlu0 %v239_v26, %s624_s2 }
 0x126   :  { %343 = vrot.lane.b32.xlu1 %v245_v34, %s624_s2  ;;  %357 = vrot.lane.b32.xlu0 %v287_v27, %s624_s2 }
 0x12a   :  { %359 = vrot.lane.b32.xlu1 %v293_v35, %s624_s2  ;;  %439 = vrot.lane.b32.xlu0 %v241_v30, %s624_s2 }
 0x12e   :  { %441 = vrot.lane.b32.xlu1 %v247_v40, %s624_s2  ;;  %455 = vrot.lane.b32.xlu0 %v289_v31, %s624_s2 }
 0x132   :  { %457 = vrot.lane.b32.xlu1 %v295_v41, %s624_s2 }
 0x164   :  { %v330_v38 = vpop.permute.xlu0 %329 }
 0x165   :  { %378 = vst.msk [vmem:[#allocation7 + $0x8] sm:$0xff] %vm87_vm0, %v330_v38 }
 0x168   :  { %v348_v39 = vpop.permute.xlu1 %347  ;;  %v346_v42 = vpop.permute.xlu0 %345 }
 0x169   :  { %387 = vst.msk [vmem:[#allocation7 + $0x128] sm:$0xff] %vm87_vm0, %v348_v39  ;;  %386 = vst.msk [vmem:[#allocation7 + $0x108] sm:$0xff] %vm87_vm0, %v346_v42 }
 0x16c   :  { %v430_v43 = vpop.permute.xlu1 %429  ;;  %v428_v44 = vpop.permute.xlu0 %427 }
 0x16d   :  { %477 = vst.msk [vmem:[#allocation7 + $0x38] sm:$0xff] %vm87_vm0, %v430_v43  ;;  %476 = vst.msk [vmem:[#allocation7 + $0x18] sm:$0xff] %vm87_vm0, %v428_v44 }
 0x170   :  { %v446_v45 = vpop.permute.xlu1 %445  ;;  %v444_v46 = vpop.permute.xlu0 %443 }
 0x171   :  { %485 = vst.msk [vmem:[#allocation7 + $0x138] sm:$0xff] %vm87_vm0, %v446_v45  ;;  %484 = vst.msk [vmem:[#allocation7 + $0x118] sm:$0xff] %vm87_vm0, %v444_v46 }
 0x174   :  { %v334_v47 = vpop.permute.xlu1 %333  ;;  %v332_v48 = vpop.permute.xlu0 %331 }
 0x175   :  { %380 = vst.msk [vmem:[#allocation7 + $0x48] sm:$0xff] %vm87_vm0, %v334_v47  ;;  %379 = vst.msk [vmem:[#allocation7 + $0x28] sm:$0xff] %vm87_vm0, %v332_v48 }
 0x178   :  { %v336_v49 = vpop.permute.xlu1 %335  ;;  %v350_v50 = vpop.permute.xlu0 %349 }
 0x179   :  { %381 = vst.msk [vmem:[#allocation7 + $0x68] sm:$0xff] %vm87_vm0, %v336_v49  ;;  %388 = vst.msk [vmem:[#allocation7 + $0x148] sm:$0xff] %vm87_vm0, %v350_v50 }
 0x17c   :  { %v352_v51 = vpop.permute.xlu1 %351  ;;  %v432_v52 = vpop.permute.xlu0 %431 }
 0x17d   :  { %389 = vst.msk [vmem:[#allocation7 + $0x168] sm:$0xff] %vm87_vm0, %v352_v51  ;;  %478 = vst.msk [vmem:[#allocation7 + $0x58] sm:$0xff] %vm87_vm0, %v432_v52 }
 0x180   :  { %v434_v53 = vpop.permute.xlu1 %433  ;;  %v448_v54 = vpop.permute.xlu0 %447 }
 0x181   :  { %479 = vst.msk [vmem:[#allocation7 + $0x78] sm:$0xff] %vm87_vm0, %v434_v53  ;;  %486 = vst.msk [vmem:[#allocation7 + $0x158] sm:$0xff] %vm87_vm0, %v448_v54 }
 0x184   :  { %v450_v55 = vpop.permute.xlu1 %449  ;;  %v338_v56 = vpop.permute.xlu0 %337 }
 0x185   :  { %487 = vst.msk [vmem:[#allocation7 + $0x178] sm:$0xff] %vm87_vm0, %v450_v55  ;;  %382 = vst.msk [vmem:[#allocation7 + $0x88] sm:$0xff] %vm87_vm0, %v338_v56 }
 0x188   :  { %v340_v57 = vpop.permute.xlu1 %339  ;;  %v354_v58 = vpop.permute.xlu0 %353 }
 0x189   :  { %383 = vst.msk [vmem:[#allocation7 + $0xa8] sm:$0xff] %vm87_vm0, %v340_v57  ;;  %390 = vst.msk [vmem:[#allocation7 + $0x188] sm:$0xff] %vm87_vm0, %v354_v58 }
 0x18c   :  { %v356_v59 = vpop.permute.xlu1 %355  ;;  %v436_v60 = vpop.permute.xlu0 %435 }
 0x18d   :  { %391 = vst.msk [vmem:[#allocation7 + $0x1a8] sm:$0xff] %vm87_vm0, %v356_v59  ;;  %480 = vst.msk [vmem:[#allocation7 + $0x98] sm:$0xff] %vm87_vm0, %v436_v60 }
 0x190   :  { %v438_v61 = vpop.permute.xlu1 %437  ;;  %v452_v62 = vpop.permute.xlu0 %451 }
 0x191   :  { %481 = vst.msk [vmem:[#allocation7 + $0xb8] sm:$0xff] %vm87_vm0, %v438_v61  ;;  %488 = vst.msk [vmem:[#allocation7 + $0x198] sm:$0xff] %vm87_vm0, %v452_v62 }
 0x194   :  { %v454_v63 = vpop.permute.xlu1 %453  ;;  %v342_v0 = vpop.permute.xlu0 %341 }
 0x195   :  { %489 = vst.msk [vmem:[#allocation7 + $0x1b8] sm:$0xff] %vm87_vm0, %v454_v63  ;;  %384 = vst.msk [vmem:[#allocation7 + $0xc8] sm:$0xff] %vm87_vm0, %v342_v0 }
 0x198   :  { %v344_v1 = vpop.permute.xlu1 %343  ;;  %v358_v2 = vpop.permute.xlu0 %357 }
 0x199   :  { %385 = vst.msk [vmem:[#allocation7 + $0xe8] sm:$0xff] %vm87_vm0, %v344_v1  ;;  %392 = vst.msk [vmem:[#allocation7 + $0x1c8] sm:$0xff] %vm87_vm0, %v358_v2 }
 0x19c   :  { %v360_v3 = vpop.permute.xlu1 %359  ;;  %v440_v4 = vpop.permute.xlu0 %439 }
 0x19d   :  { %393 = vst.msk [vmem:[#allocation7 + $0x1e8] sm:$0xff] %vm87_vm0, %v360_v3  ;;  %482 = vst.msk [vmem:[#allocation7 + $0xd8] sm:$0xff] %vm87_vm0, %v440_v4 }
 0x1a0   :  { %v442_v5 = vpop.permute.xlu1 %441  ;;  %v456_v6 = vpop.permute.xlu0 %455 }
 0x1a1   :  { %483 = vst.msk [vmem:[#allocation7 + $0xf8] sm:$0xff] %vm87_vm0, %v442_v5  ;;  %490 = vst.msk [vmem:[#allocation7 + $0x1d8] sm:$0xff] %vm87_vm0, %v456_v6 }
 0x1a4   :  { %v458_v7 = vpop.permute.xlu1 %457 }
 0x1a5   :  { %491 = vst.msk [vmem:[#allocation7 + $0x1f8] sm:$0xff] %vm87_vm0, %v458_v7 }
 0x1a6   :  { %602 = shalt.err (!%p599_p0)
}
 0x1a7   :  { %503 = dma.vmem_to_hbm [thread:$0]  %s498_s27, 8192, %s835_s3, [#allocation4], %s618_s15, %s618_s15, %s619_s16  }
 0x1a8   :  { %615 = dma.done.wait [#allocation4], 8192  }
 0x1a9   :  { %616 = vsyncadd [#allocation4], 4294959104 }
 0x1aa   :  { %507 = vsyncpa [#allocation3], 1 }
 0x1ab   :  { %508 = vsyncpa [#allocation6], 1 }
 0x1ac   :  { %509 = vsyncpa [#allocation4], 1 }

// kernel: tpu_custom_call.1
= control target key start
LH: loop header
LB: loop body
LE: loop exit
PB: predicated region body
PF: predicated region fallthrough
CT: control target
= control target key end

     0   :  { %8 = vsyncpa [#allocation3], 0  ;;  %s832_s0 = inlined_call_operand.hbm [shape: f32[16,8,64], index: 0, kind: input, shape index: {}]   ;;  %s833_s1 = inlined_call_operand.hbm [shape: f32[64,256], index: 1, kind: input, shape index: {}]   ;;  %s834_s2 = inlined_call_operand.vmem [shape: f32[1,256], index: 2, kind: input, shape index: {}]   ;;  %s835_s3 = inlined_call_operand.hbm [shape: f32[16,4,8,64], index: 3, kind: output, shape index: {}]  }
   0x1   :  { %9 = vsyncpa [#allocation6], 0 }
   0x2   :  { %10 = vsyncpa [#allocation4], 0  ;;  %s617_s12 = smov [#allocation2]  }
   0x3   :  { %s16_s13 = sshll.u32 %s617_s12, 4  ;;  %s17_s13 = int_to_ptr.vmem [resolvable:$true] %s16_s13 }
   0x4   :  { %s559_s14 = scalar_lea.vmem %s17_s13, 2048  ;;  %p564_p1 = scmp.lt.s32.totalorder %s17_s13, %s17_s13 }
   0x5   :  { %p560_p0 = scmp.ne.s32.totalorder %s17_s13, %s559_s14  ;;  %p565_p2 = scmp.lt.s32.totalorder %s559_s14, %s559_s14 }
   0x7   :  { %p566_p3 = por %p565_p2, %p564_p1 }
   0x9   :  { %p567_p4 = pnand %p566_p3, %p560_p0 }
   0xb   :  { %570 = shalt.err (!%p567_p4)
}
   0xc   :  { %s618_s15 = smov 128   ;;  %s619_s16 = smov 8  }
   0xd   :  { %22 = dma.hbm_to_vmem [thread:$0]  %s832_s0, 2048, %s17_s13, [#allocation3], %s618_s15, %s618_s15, %s619_s16  }
   0xe   :  { %s620_s19 = smov [#allocation5]  }
   0xf   :  { %s28_s20 = sshll.u32 %s620_s19, 4  ;;  %s29_s20 = int_to_ptr.vmem [resolvable:$true] %s28_s20 }
  0x10   :  { %s579_s21 = scalar_lea.vmem %s29_s20, 2048  ;;  %p584_p6 = scmp.lt.s32.totalorder %s29_s20, %s29_s20 }
  0x11   :  { %p580_p5 = scmp.ne.s32.totalorder %s29_s20, %s579_s21  ;;  %p585_p7 = scmp.lt.s32.totalorder %s579_s21, %s579_s21 }
  0x13   :  { %p586_p8 = por %p585_p7, %p584_p6 }
  0x15   :  { %p587_p9 = pnand %p586_p8, %p580_p5 }
  0x17   :  { %590 = shalt.err (!%p587_p9)
}
  0x18   :  { %s621_s22 = smov 256   ;;  %s622_s23 = smov 16  }
  0x19   :  { %34 = dma.hbm_to_vmem [thread:$0]  %s833_s1, 2048, %s29_s20, [#allocation6], %s621_s22, %s621_s22, %s622_s23  }
  0x1a   :  { %611 = dma.done.wait [#allocation3], 2048  }
  0x1b   :  { %612 = vsyncadd [#allocation3], 4294965248 }
  0x1c   :  { %613 = dma.done.wait [#allocation6], 2048  }
  0x1d   :  { %614 = vsyncadd [#allocation6], 4294965248  ;;  %v623_v0 = vmov 0.0   ;;  %v74_v1 = vld [vmem:[#allocation5 + $0x78] sm:$0xff]  ;;  %v73_v2 = vld [vmem:[#allocation5 + $0x70] sm:$0xff]  ;;  %vm87_vm0 = vcmask 523264   ;;  %v77_v33 = vlaneseq }
  0x1e   :  { %200 = vmatprep.mubr.f32.mxu0 %v623_v0  ;;  %248 = vmatprep.mubr.f32.mxu1 %v623_v0  ;;  %v72_v3 = vld [vmem:[#allocation5 + $0x68] sm:$0xff]  ;;  %v71_v4 = vld [vmem:[#allocation5 + $0x60] sm:$0xff]  ;;  %v70_v5 = vld [vmem:[#allocation5 + $0x58] sm:$0xff]  ;;  %s625_s26 = smov [#allocation7]  }
  0x1f   :  { %152 = vmatprep.subr.mxu0 %v74_v1  ;;  %526 = vmatprep.subr.mxu1 %v74_v1  ;;  %v69_v6 = vld [vmem:[#allocation5 + $0x50] sm:$0xff]  ;;  %v68_v7 = vld [vmem:[#allocation5 + $0x48] sm:$0xff]  ;;  %v67_v8 = vld [vmem:[#allocation5 + $0x40] sm:$0xff]  ;;  %v78_v34 = vshrl.u32 %v77_v33, 7  ;;  %s497_s27 = sshll.u32 %s625_s26, 4  ;;  %s498_s27 = int_to_ptr.vmem [resolvable:$true] %s497_s27 }
  0x20   :  { %153 = vmatpush1.msra.mxu0 %v73_v2  ;;  %534 = vmatpush1.msra.mxu1 %v73_v2  ;;  %v66_v9 = vld [vmem:[#allocation5 + $0x38] sm:$0xff]  ;;  %v65_v10 = vld [vmem:[#allocation5 + $0x30] sm:$0xff]  ;;  %v64_v11 = vld [vmem:[#allocation5 + $0x28] sm:$0xff]  ;;  %s591_s28 = scalar_lea.vmem %s498_s27, 8192  ;;  %p596_p11 = scmp.lt.s32.totalorder %s498_s27, %s498_s27 }
  0x21   :  { %154 = vmatprep.subr.mxu0 %v72_v3  ;;  %527 = vmatprep.subr.mxu1 %v72_v3  ;;  %v63_v12 = vld [vmem:[#allocation5 + $0x20] sm:$0xff]  ;;  %v62_v13 = vld [vmem:[#allocation5 + $0x18] sm:$0xff]  ;;  %v61_v14 = vld [vmem:[#allocation5 + $0x10] sm:$0xff]  ;;  %v79_v35 = vsub.s32 0, %v78_v34  ;;  %v83_v37 = vsub.s32 1, %v78_v34  ;;  %p592_p10 = scmp.ne.s32.totalorder %s498_s27, %s591_s28  ;;  %p597_p12 = scmp.lt.s32.totalorder %s591_s28, %s591_s28 }
  0x22   :  { %155 = vmatpush1.msra.mxu0 %v71_v4  ;;  %535 = vmatpush1.msra.mxu1 %v71_v4  ;;  %v60_v15 = vld [vmem:[#allocation5 + $0x8] sm:$0xff]  ;;  %v59_v16 = vld [vmem:[#allocation5] sm:$0xff]  ;;  %v45_v21 = vld [vmem:[#allocation2 + $0x10] sm:$0xff] }
  0x23   :  { %156 = vmatprep.subr.mxu0 %v70_v5  ;;  %528 = vmatprep.subr.mxu1 %v70_v5  ;;  %v43_v17 = vld [vmem:[#allocation2] sm:$0xff]  ;;  %v44_v19 = vld [vmem:[#allocation2 + $0x8] sm:$0xff]  ;;  %v53_v22 = vld [vmem:[#allocation2 + $0x50] sm:$0xff]  ;;  %p598_p13 = por %p597_p12, %p596_p11 }
  0x24   :  { %157 = vmatpush1.msra.mxu0 %v69_v6  ;;  %536 = vmatpush1.msra.mxu1 %v69_v6  ;;  %v51_v18 = vld [vmem:[#allocation2 + $0x40] sm:$0xff]  ;;  %v52_v20 = vld [vmem:[#allocation2 + $0x48] sm:$0xff]  ;;  %v46_v23 = vld [vmem:[#allocation2 + $0x18] sm:$0xff] }
  0x25   :  { %158 = vmatprep.subr.mxu0 %v68_v7  ;;  %529 = vmatprep.subr.mxu1 %v68_v7  ;;  %v54_v24 = vld [vmem:[#allocation2 + $0x58] sm:$0xff]  ;;  %v47_v25 = vld [vmem:[#allocation2 + $0x20] sm:$0xff]  ;;  %v48_v27 = vld [vmem:[#allocation2 + $0x28] sm:$0xff]  ;;  %p599_p0 = pnand %p598_p13, %p592_p10 }
  0x26   :  { %159 = vmatpush1.msra.mxu0 %v67_v8  ;;  %537 = vmatpush1.msra.mxu1 %v67_v8  ;;  %v55_v26 = vld [vmem:[#allocation2 + $0x60] sm:$0xff]  ;;  %v56_v28 = vld [vmem:[#allocation2 + $0x68] sm:$0xff]  ;;  %v49_v29 = vld [vmem:[#allocation2 + $0x30] sm:$0xff] }
  0x27   :  { %160 = vmatprep.subr.mxu0 %v66_v9  ;;  %530 = vmatprep.subr.mxu1 %v66_v9  ;;  %v57_v30 = vld [vmem:[#allocation2 + $0x70] sm:$0xff]  ;;  %v50_v31 = vld [vmem:[#allocation2 + $0x38] sm:$0xff]  ;;  %v75_v36 = vld [vmem:[%s834_s2] sm:$0x3]  ;;  %s624_s2 = smov 64  }
  0x28   :  { %161 = vmatpush1.msra.mxu0 %v65_v10  ;;  %538 = vmatpush1.msra.mxu1 %v65_v10  ;;  %v58_v32 = vld [vmem:[#allocation2 + $0x78] sm:$0xff]  ;;  %v690_v38 = vrot.slane %v75_v36, %v79_v35  ;;  %v692_v39 = vrot.slane %v75_v36, %v83_v37 }
  0x29   :  { %162 = vmatprep.subr.mxu0 %v64_v11  ;;  %531 = vmatprep.subr.mxu1 %v64_v11 }
  0x2a   :  { %163 = vmatpush1.msra.mxu0 %v63_v12  ;;  %539 = vmatpush1.msra.mxu1 %v63_v12 }
  0x2b   :  { %164 = vmatprep.subr.mxu0 %v62_v13  ;;  %532 = vmatprep.subr.mxu1 %v62_v13 }
  0x2c   :  { %165 = vmatpush1.msra.mxu0 %v61_v14  ;;  %540 = vmatpush1.msra.mxu1 %v61_v14 }
  0x2d   :  { %166 = vmatprep.subr.mxu0 %v60_v15  ;;  %533 = vmatprep.subr.mxu1 %v60_v15 }
  0x2e   :  { %167 = vmatpush1.msra.mxu0 %v59_v16  ;;  %541 = vmatpush1.msra.mxu1 %v59_v16 }
  0x2f   :  { %510 = vmatmul.mubr.msk.f32.vlgmr.msra.gmra.mxu0 %vm87_vm0, %v43_v17  ;;  %518 = vmatmul.mubr.msk.f32.vlgmr.msra.gmra.mxu1 %vm87_vm0, %v51_v18 }
  0x30   :  { %206 = vmatprep.mubr.f32.mxu0 %v623_v0  ;;  %254 = vmatprep.mubr.f32.mxu1 %v623_v0 }
  0x33   :  { %511 = vmatmul.mubr.msk.f32.gmra.mxu0 %vm87_vm0, %v44_v19  ;;  %519 = vmatmul.mubr.msk.f32.gmra.mxu1 %vm87_vm0, %v52_v20 }
  0x34   :  { %212 = vmatprep.mubr.f32.mxu0 %v623_v0  ;;  %260 = vmatprep.mubr.f32.mxu1 %v623_v0 }
  0x37   :  { %512 = vmatmul.mubr.msk.f32.gmra.mxu0 %vm87_vm0, %v45_v21  ;;  %520 = vmatmul.mubr.msk.f32.gmra.mxu1 %vm87_vm0, %v53_v22 }
  0x38   :  { %218 = vmatprep.mubr.f32.mxu0 %v623_v0  ;;  %266 = vmatprep.mubr.f32.mxu1 %v623_v0 }
  0x3b   :  { %513 = vmatmul.mubr.msk.f32.gmra.mxu0 %vm87_vm0, %v46_v23  ;;  %521 = vmatmul.mubr.msk.f32.gmra.mxu1 %vm87_vm0, %v54_v24 }
  0x3c   :  { %224 = vmatprep.mubr.f32.mxu0 %v623_v0  ;;  %272 = vmatprep.mubr.f32.mxu1 %v623_v0 }
  0x3f   :  { %514 = vmatmul.mubr.msk.f32.gmra.mxu0 %vm87_vm0, %v47_v25  ;;  %522 = vmatmul.mubr.msk.f32.gmra.mxu1 %vm87_vm0, %v55_v26 }
  0x40   :  { %230 = vmatprep.mubr.f32.mxu0 %v623_v0  ;;  %278 = vmatprep.mubr.f32.mxu1 %v623_v0 }
  0x43   :  { %515 = vmatmul.mubr.msk.f32.gmra.mxu0 %vm87_vm0, %v48_v27  ;;  %523 = vmatmul.mubr.msk.f32.gmra.mxu1 %vm87_vm0, %v56_v28 }
  0x44   :  { %236 = vmatprep.mubr.f32.mxu0 %v623_v0  ;;  %284 = vmatprep.mubr.f32.mxu1 %v623_v0 }
  0x47   :  { %516 = vmatmul.mubr.msk.f32.gmra.mxu0 %vm87_vm0, %v49_v29  ;;  %524 = vmatmul.mubr.msk.f32.gmra.mxu1 %vm87_vm0, %v57_v30 }
  0x48   :  { %242 = vmatprep.mubr.f32.mxu0 %v623_v0  ;;  %290 = vmatprep.mubr.f32.mxu1 %v623_v0 }
  0x4b   :  { %517 = vmatmul.mubr.msk.f32.gmra.mxu0 %vm87_vm0, %v50_v31  ;;  %525 = vmatmul.mubr.msk.f32.gmra.mxu1 %vm87_vm0, %v58_v32 }
  0xef   :  { %v202_v40 = vpop.f32.mrf.mxu0  ;;  %v250_v41 = vpop.f32.mrf.mxu1 }
  0xf0   :  { %v203_v42 = vadd.f32 %v202_v40, %v690_v38  ;;  %v251_v43 = vadd.f32 %v250_v41, %v690_v38 }
  0xf1   :  { %v204_v44 = vpop.f32.mrf.mxu0  ;;  %v252_v45 = vpop.f32.mrf.mxu1 }
  0xf2   :  { %297 = vst.msk [vmem:[#allocation7] sm:$0xff] %vm87_vm0, %v203_v42  ;;  %305 = vst.msk [vmem:[#allocation7 + $0x100] sm:$0xff] %vm87_vm0, %v251_v43  ;;  %v205_v46 = vadd.f32 %v204_v44, %v692_v39  ;;  %v253_v47 = vadd.f32 %v252_v45, %v692_v39  ;;  %329 = vrot.lane.b32.xlu0 %v203_v42, %s624_s2 }
  0xf3   :  { %v208_v48 = vpop.f32.mrf.mxu0  ;;  %v256_v49 = vpop.f32.mrf.mxu1 }
  0xf4   :  { %395 = vst.msk [vmem:[#allocation7 + $0x10] sm:$0xff] %vm87_vm0, %v205_v46  ;;  %403 = vst.msk [vmem:[#allocation7 + $0x110] sm:$0xff] %vm87_vm0, %v253_v47  ;;  %v209_v50 = vadd.f32 %v208_v48, %v690_v38  ;;  %v257_v51 = vadd.f32 %v256_v49, %v690_v38 }
  0xf5   :  { %v210_v52 = vpop.f32.mrf.mxu0  ;;  %v258_v53 = vpop.f32.mrf.mxu1 }
  0xf6   :  { %298 = vst.msk [vmem:[#allocation7 + $0x20] sm:$0xff] %vm87_vm0, %v209_v50  ;;  %306 = vst.msk [vmem:[#allocation7 + $0x120] sm:$0xff] %vm87_vm0, %v257_v51  ;;  %v211_v54 = vadd.f32 %v210_v52, %v692_v39  ;;  %v259_v55 = vadd.f32 %v258_v53, %v692_v39  ;;  %347 = vrot.lane.b32.xlu1 %v257_v51, %s624_s2  ;;  %345 = vrot.lane.b32.xlu0 %v251_v43, %s624_s2 }
  0xf7   :  { %v214_v56 = vpop.f32.mrf.mxu0  ;;  %v262_v57 = vpop.f32.mrf.mxu1 }
  0xf8   :  { %396 = vst.msk [vmem:[#allocation7 + $0x30] sm:$0xff] %vm87_vm0, %v211_v54  ;;  %404 = vst.msk [vmem:[#allocation7 + $0x130] sm:$0xff] %vm87_vm0, %v259_v55  ;;  %v215_v58 = vadd.f32 %v214_v56, %v690_v38  ;;  %v263_v59 = vadd.f32 %v262_v57, %v690_v38 }
  0xf9   :  { %v216_v60 = vpop.f32.mrf.mxu0  ;;  %v264_v61 = vpop.f32.mrf.mxu1 }
  0xfa   :  { %429 = vrot.lane.b32.xlu1 %v211_v54, %s624_s2  ;;  %427 = vrot.lane.b32.xlu0 %v205_v46, %s624_s2  ;;  %299 = vst.msk [vmem:[#allocation7 + $0x40] sm:$0xff] %vm87_vm0, %v215_v58  ;;  %v217_v62 = vadd.f32 %v216_v60, %v692_v39  ;;  %307 = vst.msk [vmem:[#allocation7 + $0x140] sm:$0xff] %vm87_vm0, %v263_v59  ;;  %v721_v63 = vadd.f32 %v264_v61, %v692_v39 }
  0xfb   :  { %v220_v0 = vpop.f32.mrf.mxu0  ;;  %v268_v1 = vpop.f32.mrf.mxu1 }
  0xfc   :  { %397 = vst.msk [vmem:[#allocation7 + $0x50] sm:$0xff] %vm87_vm0, %v217_v62  ;;  %v221_v2 = vadd.f32 %v220_v0, %v690_v38  ;;  %405 = vst.msk [vmem:[#allocation7 + $0x150] sm:$0xff] %vm87_vm0, %v721_v63  ;;  %v269_v3 = vadd.f32 %v268_v1, %v690_v38 }
  0xfd   :  { %v222_v4 = vpop.f32.mrf.mxu0  ;;  %v270_v5 = vpop.f32.mrf.mxu1 }
  0xfe   :  { %445 = vrot.lane.b32.xlu1 %v259_v55, %s624_s2  ;;  %443 = vrot.lane.b32.xlu0 %v253_v47, %s624_s2  ;;  %300 = vst.msk [vmem:[#allocation7 + $0x60] sm:$0xff] %vm87_vm0, %v221_v2  ;;  %v223_v6 = vadd.f32 %v222_v4, %v692_v39  ;;  %308 = vst.msk [vmem:[#allocation7 + $0x160] sm:$0xff] %vm87_vm0, %v269_v3  ;;  %v271_v7 = vadd.f32 %v270_v5, %v692_v39 }
  0xff   :  { %v226_v8 = vpop.f32.mrf.mxu0  ;;  %v274_v9 = vpop.f32.mrf.mxu1 }
 0x100   :  { %398 = vst.msk [vmem:[#allocation7 + $0x70] sm:$0xff] %vm87_vm0, %v223_v6  ;;  %406 = vst.msk [vmem:[#allocation7 + $0x170] sm:$0xff] %vm87_vm0, %v271_v7  ;;  %v227_v10 = vadd.f32 %v226_v8, %v690_v38  ;;  %v275_v11 = vadd.f32 %v274_v9, %v690_v38 }
 0x101   :  { %v228_v12 = vpop.f32.mrf.mxu0  ;;  %v276_v13 = vpop.f32.mrf.mxu1 }
 0x102   :  { %333 = vrot.lane.b32.xlu1 %v215_v58, %s624_s2  ;;  %331 = vrot.lane.b32.xlu0 %v209_v50, %s624_s2  ;;  %301 = vst.msk [vmem:[#allocation7 + $0x80] sm:$0xff] %vm87_vm0, %v227_v10  ;;  %v229_v14 = vadd.f32 %v228_v12, %v692_v39  ;;  %309 = vst.msk [vmem:[#allocation7 + $0x180] sm:$0xff] %vm87_vm0, %v275_v11  ;;  %v277_v15 = vadd.f32 %v276_v13, %v692_v39 }
 0x103   :  { %v232_v16 = vpop.f32.mrf.mxu0  ;;  %v280_v17 = vpop.f32.mrf.mxu1 }
 0x104   :  { %399 = vst.msk [vmem:[#allocation7 + $0x90] sm:$0xff] %vm87_vm0, %v229_v14  ;;  %v233_v18 = vadd.f32 %v232_v16, %v690_v38  ;;  %407 = vst.msk [vmem:[#allocation7 + $0x190] sm:$0xff] %vm87_vm0, %v277_v15  ;;  %v281_v19 = vadd.f32 %v280_v17, %v690_v38 }
 0x105   :  { %v234_v20 = vpop.f32.mrf.mxu0  ;;  %v282_v21 = vpop.f32.mrf.mxu1 }
 0x106   :  { %335 = vrot.lane.b32.xlu1 %v221_v2, %s624_s2  ;;  %349 = vrot.lane.b32.xlu0 %v263_v59, %s624_s2  ;;  %302 = vst.msk [vmem:[#allocation7 + $0xa0] sm:$0xff] %vm87_vm0, %v233_v18  ;;  %v235_v22 = vadd.f32 %v234_v20, %v692_v39  ;;  %310 = vst.msk [vmem:[#allocation7 + $0x1a0] sm:$0xff] %vm87_vm0, %v281_v19  ;;  %v283_v23 = vadd.f32 %v282_v21, %v692_v39 }
 0x107   :  { %v238_v24 = vpop.f32.mrf.mxu0  ;;  %v286_v25 = vpop.f32.mrf.mxu1 }
 0x108   :  { %400 = vst.msk [vmem:[#allocation7 + $0xb0] sm:$0xff] %vm87_vm0, %v235_v22  ;;  %408 = vst.msk [vmem:[#allocation7 + $0x1b0] sm:$0xff] %vm87_vm0, %v283_v23  ;;  %v239_v26 = vadd.f32 %v238_v24, %v690_v38  ;;  %v287_v27 = vadd.f32 %v286_v25, %v690_v38 }
 0x109   :  { %v240_v28 = vpop.f32.mrf.mxu0  ;;  %v288_v29 = vpop.f32.mrf.mxu1 }
 0x10a   :  { %351 = vrot.lane.b32.xlu1 %v269_v3, %s624_s2  ;;  %431 = vrot.lane.b32.xlu0 %v217_v62, %s624_s2  ;;  %303 = vst.msk [vmem:[#allocation7 + $0xc0] sm:$0xff] %vm87_vm0, %v239_v26  ;;  %v241_v30 = vadd.f32 %v240_v28, %v692_v39  ;;  %311 = vst.msk [vmem:[#allocation7 + $0x1c0] sm:$0xff] %vm87_vm0, %v287_v27  ;;  %v289_v31 = vadd.f32 %v288_v29, %v692_v39 }
 0x10b   :  { %v244_v32 = vpop.f32.mrf.mxu0  ;;  %v292_v33 = vpop.f32.mrf.mxu1 }
 0x10c   :  { %401 = vst.msk [vmem:[#allocation7 + $0xd0] sm:$0xff] %vm87_vm0, %v241_v30  ;;  %v245_v34 = vadd.f32 %v244_v32, %v690_v38  ;;  %409 = vst.msk [vmem:[#allocation7 + $0x1d0] sm:$0xff] %vm87_vm0, %v289_v31  ;;  %v293_v35 = vadd.f32 %v292_v33, %v690_v38 }
 0x10d   :  { %v246_v36 = vpop.f32.mrf.mxu0  ;;  %v294_v37 = vpop.f32.mrf.mxu1 }
 0x10e   :  { %433 = vrot.lane.b32.xlu1 %v223_v6, %s624_s2  ;;  %447 = vrot.lane.b32.xlu0 %v721_v63, %s624_s2  ;;  %304 = vst.msk [vmem:[#allocation7 + $0xe0] sm:$0xff] %vm87_vm0, %v245_v34  ;;  %v247_v40 = vadd.f32 %v246_v36, %v692_v39  ;;  %312 = vst.msk [vmem:[#allocation7 + $0x1e0] sm:$0xff] %vm87_vm0, %v293_v35  ;;  %v295_v41 = vadd.f32 %v294_v37, %v692_v39 }
 0x110   :  { %402 = vst.msk [vmem:[#allocation7 + $0xf0] sm:$0xff] %vm87_vm0, %v247_v40  ;;  %410 = vst.msk [vmem:[#allocation7 + $0x1f0] sm:$0xff] %vm87_vm0, %v295_v41 }
 0x112   :  { %449 = vrot.lane.b32.xlu1 %v271_v7, %s624_s2  ;;  %337 = vrot.lane.b32.xlu0 %v227_v10, %s624_s2 }
 0x116   :  { %339 = vrot.lane.b32.xlu1 %v233_v18, %s624_s2  ;;  %353 = vrot.lane.b32.xlu0 %v275_v11, %s624_s2 }
 0x11a   :  { %355 = vrot.lane.b32.xlu1 %v281_v19, %s624_s2  ;;  %435 = vrot.lane.b32.xlu0 %v229_v14, %s624_s2 }
 0x11e   :  { %437 = vrot.lane.b32.xlu1 %v235_v22, %s624_s2  ;;  %451 = vrot.lane.b32.xlu0 %v277_v15, %s624_s2 }
 0x122   :  { %453 = vrot.lane.b32.xlu1 %v283_v23, %s624_s2  ;;  %341 = vrot.lane.b32.xlu0 %v239_v26, %s624_s2 }
 0x126   :  { %343 = vrot.lane.b32.xlu1 %v245_v34, %s624_s2  ;;  %357 = vrot.lane.b32.xlu0 %v287_v27, %s624_s2 }
 0x12a   :  { %359 = vrot.lane.b32.xlu1 %v293_v35, %s624_s2  ;;  %439 = vrot.lane.b32.xlu0 %v241_v30, %s624_s2 }
 0x12e   :  { %441 = vrot.lane.b32.xlu1 %v247_v40, %s624_s2  ;;  %455 = vrot.lane.b32.xlu0 %v289_v31, %s624_s2 }
 0x132   :  { %457 = vrot.lane.b32.xlu1 %v295_v41, %s624_s2 }
 0x164   :  { %v330_v38 = vpop.permute.xlu0 %329 }
 0x165   :  { %378 = vst.msk [vmem:[#allocation7 + $0x8] sm:$0xff] %vm87_vm0, %v330_v38 }
 0x168   :  { %v348_v39 = vpop.permute.xlu1 %347  ;;  %v346_v42 = vpop.permute.xlu0 %345 }
 0x169   :  { %387 = vst.msk [vmem:[#allocation7 + $0x128] sm:$0xff] %vm87_vm0, %v348_v39  ;;  %386 = vst.msk [vmem:[#allocation7 + $0x108] sm:$0xff] %vm87_vm0, %v346_v42 }
 0x16c   :  { %v430_v43 = vpop.permute.xlu1 %429  ;;  %v428_v44 = vpop.permute.xlu0 %427 }
 0x16d   :  { %477 = vst.msk [vmem:[#allocation7 + $0x38] sm:$0xff] %vm87_vm0, %v430_v43  ;;  %476 = vst.msk [vmem:[#allocation7 + $0x18] sm:$0xff] %vm87_vm0, %v428_v44 }
 0x170   :  { %v446_v45 = vpop.permute.xlu1 %445  ;;  %v444_v46 = vpop.permute.xlu0 %443 }
 0x171   :  { %485 = vst.msk [vmem:[#allocation7 + $0x138] sm:$0xff] %vm87_vm0, %v446_v45  ;;  %484 = vst.msk [vmem:[#allocation7 + $0x118] sm:$0xff] %vm87_vm0, %v444_v46 }
 0x174   :  { %v334_v47 = vpop.permute.xlu1 %333  ;;  %v332_v48 = vpop.permute.xlu0 %331 }
 0x175   :  { %380 = vst.msk [vmem:[#allocation7 + $0x48] sm:$0xff] %vm87_vm0, %v334_v47  ;;  %379 = vst.msk [vmem:[#allocation7 + $0x28] sm:$0xff] %vm87_vm0, %v332_v48 }
 0x178   :  { %v336_v49 = vpop.permute.xlu1 %335  ;;  %v350_v50 = vpop.permute.xlu0 %349 }
 0x179   :  { %381 = vst.msk [vmem:[#allocation7 + $0x68] sm:$0xff] %vm87_vm0, %v336_v49  ;;  %388 = vst.msk [vmem:[#allocation7 + $0x148] sm:$0xff] %vm87_vm0, %v350_v50 }
 0x17c   :  { %v352_v51 = vpop.permute.xlu1 %351  ;;  %v432_v52 = vpop.permute.xlu0 %431 }
 0x17d   :  { %389 = vst.msk [vmem:[#allocation7 + $0x168] sm:$0xff] %vm87_vm0, %v352_v51  ;;  %478 = vst.msk [vmem:[#allocation7 + $0x58] sm:$0xff] %vm87_vm0, %v432_v52 }
 0x180   :  { %v434_v53 = vpop.permute.xlu1 %433  ;;  %v448_v54 = vpop.permute.xlu0 %447 }
 0x181   :  { %479 = vst.msk [vmem:[#allocation7 + $0x78] sm:$0xff] %vm87_vm0, %v434_v53  ;;  %486 = vst.msk [vmem:[#allocation7 + $0x158] sm:$0xff] %vm87_vm0, %v448_v54 }
 0x184   :  { %v450_v55 = vpop.permute.xlu1 %449  ;;  %v338_v56 = vpop.permute.xlu0 %337 }
 0x185   :  { %487 = vst.msk [vmem:[#allocation7 + $0x178] sm:$0xff] %vm87_vm0, %v450_v55  ;;  %382 = vst.msk [vmem:[#allocation7 + $0x88] sm:$0xff] %vm87_vm0, %v338_v56 }
 0x188   :  { %v340_v57 = vpop.permute.xlu1 %339  ;;  %v354_v58 = vpop.permute.xlu0 %353 }
 0x189   :  { %383 = vst.msk [vmem:[#allocation7 + $0xa8] sm:$0xff] %vm87_vm0, %v340_v57  ;;  %390 = vst.msk [vmem:[#allocation7 + $0x188] sm:$0xff] %vm87_vm0, %v354_v58 }
 0x18c   :  { %v356_v59 = vpop.permute.xlu1 %355  ;;  %v436_v60 = vpop.permute.xlu0 %435 }
 0x18d   :  { %391 = vst.msk [vmem:[#allocation7 + $0x1a8] sm:$0xff] %vm87_vm0, %v356_v59  ;;  %480 = vst.msk [vmem:[#allocation7 + $0x98] sm:$0xff] %vm87_vm0, %v436_v60 }
 0x190   :  { %v438_v61 = vpop.permute.xlu1 %437  ;;  %v452_v62 = vpop.permute.xlu0 %451 }
 0x191   :  { %481 = vst.msk [vmem:[#allocation7 + $0xb8] sm:$0xff] %vm87_vm0, %v438_v61  ;;  %488 = vst.msk [vmem:[#allocation7 + $0x198] sm:$0xff] %vm87_vm0, %v452_v62 }
 0x194   :  { %v454_v63 = vpop.permute.xlu1 %453  ;;  %v342_v0 = vpop.permute.xlu0 %341 }
 0x195   :  { %489 = vst.msk [vmem:[#allocation7 + $0x1b8] sm:$0xff] %vm87_vm0, %v454_v63  ;;  %384 = vst.msk [vmem:[#allocation7 + $0xc8] sm:$0xff] %vm87_vm0, %v342_v0 }
 0x198   :  { %v344_v1 = vpop.permute.xlu1 %343  ;;  %v358_v2 = vpop.permute.xlu0 %357 }
 0x199   :  { %385 = vst.msk [vmem:[#allocation7 + $0xe8] sm:$0xff] %vm87_vm0, %v344_v1  ;;  %392 = vst.msk [vmem:[#allocation7 + $0x1c8] sm:$0xff] %vm87_vm0, %v358_v2 }
 0x19c   :  { %v360_v3 = vpop.permute.xlu1 %359  ;;  %v440_v4 = vpop.permute.xlu0 %439 }
 0x19d   :  { %393 = vst.msk [vmem:[#allocation7 + $0x1e8] sm:$0xff] %vm87_vm0, %v360_v3  ;;  %482 = vst.msk [vmem:[#allocation7 + $0xd8] sm:$0xff] %vm87_vm0, %v440_v4 }
 0x1a0   :  { %v442_v5 = vpop.permute.xlu1 %441  ;;  %v456_v6 = vpop.permute.xlu0 %455 }
 0x1a1   :  { %483 = vst.msk [vmem:[#allocation7 + $0xf8] sm:$0xff] %vm87_vm0, %v442_v5  ;;  %490 = vst.msk [vmem:[#allocation7 + $0x1d8] sm:$0xff] %vm87_vm0, %v456_v6 }
 0x1a4   :  { %v458_v7 = vpop.permute.xlu1 %457 }
 0x1a5   :  { %491 = vst.msk [vmem:[#allocation7 + $0x1f8] sm:$0xff] %vm87_vm0, %v458_v7 }
 0x1a6   :  { %602 = shalt.err (!%p599_p0)
}
 0x1a7   :  { %503 = dma.vmem_to_hbm [thread:$0]  %s498_s27, 8192, %s835_s3, [#allocation4], %s618_s15, %s618_s15, %s619_s16  }
 0x1a8   :  { %615 = dma.done.wait [#allocation4], 8192  }
 0x1a9   :  { %616 = vsyncadd [#allocation4], 4294959104 }
 0x1aa   :  { %507 = vsyncpa [#allocation3], 1 }
 0x1ab   :  { %508 = vsyncpa [#allocation6], 1 }
 0x1ac   :  { %509 = vsyncpa [#allocation4], 1 }

</bundles_post_ra>
